<compile_context>
chip_gen: v6e
topology: v6e:2x2x1
jax: 0.10.0
libtpu: 0.0.40
codegen_flags: <defaults>
</compile_context>

<pallas_src>
import jax
import jax.numpy as jnp
import numpy as np
from jax.experimental import pallas as pl
from jax.experimental.pallas import tpu as pltpu


def _round_up(v, m):
    return ((v + m - 1) // m) * m


def _node_model_kernel(cs_ref, cc_ref,                       # scalar prefetch (SMEM)
                       slab_ref, col_ref, eaug_ref, et_ref,  # inputs
                       w1_ref, b1_ref, w2_ref, b2_ref,
                       o_ref,                                # output
                       acc_sc, mxw_sc, feat_sc):             # scratch
    TN = o_ref.shape[0]              # node tile
    EC = col_ref.shape[1]            # edge chunk
    F = et_ref.shape[0]              # edge feature width
    node_in = o_ref.shape[1]
    din = slab_ref.shape[1]

    i = pl.program_id(0)
    j = pl.program_id(1)
    n_chunks = pl.num_programs(1)
    neg = jnp.float32(-jnp.inf)

    @pl.when(j == 0)
    def _init():
        acc_sc[...] = jnp.zeros(acc_sc.shape, acc_sc.dtype)
        mxw_sc[...] = jnp.full(mxw_sc.shape, neg, mxw_sc.dtype)

    # Only real chunks of this node tile do work; over-scan chunks (padding the tile
    # to the static max chunk count) are skipped.
    @pl.when(j < cc_ref[i])
    def _accumulate():
        # membership mask: local node id == col - tile_base  (padded col = -1 never matches)
        base = i * TN
        col_local = col_ref[...] - base                                  # (1, EC)
        node_ids = jax.lax.broadcasted_iota(jnp.int32, (TN, EC), 0)      # (TN, EC)
        mask = node_ids == col_local                                     # (TN, EC)

        # scatter_add + in-degree count: one MXU matmul (ones column folded in)
        onehot = mask.astype(eaug_ref.dtype)                             # bf16 default
        acc_sc[...] += jnp.dot(onehot, eaug_ref[...],
                               preferred_element_type=jnp.float32)       # (TN, F+1)

        # scatter_max, deferred: element-wise running max per F slab.  No cross-lane
        # reduce here (that would saturate the XLU slot); pure VPU streaming.
        et = et_ref[...]                                                 # (F, EC) f32
        for f in range(F):                                               # static unroll
            vals = jnp.where(mask, et[f:f + 1, :], neg)                  # (TN, EC)
            mxw_sc[f] = jnp.maximum(mxw_sc[f], vals)

    # finalize: single lane reduce + MLP + residual, once per node tile
    @pl.when(j == n_chunks - 1)
    def _finalize():
        slab = slab_ref[...]                          # [x | 0 | 0 | 0 | u[batch]]
        x = slab[:, :node_in]
        acc = acc_sc[...]
        s = acc[:, :F]                                # scatter_add
        cnt = acc[:, F:F + 1]                         # in-degree
        mean = s / jnp.maximum(cnt, 1.0)              # scatter_mean
        mx = jnp.concatenate(
            [jnp.max(mxw_sc[f], axis=-1, keepdims=True) for f in range(F)],
            axis=1)                                   # one XLU reduce per feature/tile
        mx = jnp.where(cnt > 0.0, mx, 0.0)            # scatter_max (no in-edges -> 0)

        # fill the sum/max/mean columns of the pre-packed slab -> single K=din matmul
        feat_sc[...] = slab
        feat_sc[:, node_in:node_in + F] = s
        feat_sc[:, node_in + F:node_in + 2 * F] = mx
        feat_sc[:, node_in + 2 * F:node_in + 3 * F] = mean

        h = jnp.dot(feat_sc[...], w1_ref[...],
                    preferred_element_type=jnp.float32) + b1_ref[...]
        h = jnp.maximum(h, 0.0)                       # ReLU
        out = jnp.dot(h, w2_ref[...],
                      preferred_element_type=jnp.float32) + b2_ref[...]
        o_ref[...] = (out + x).astype(o_ref.dtype)    # residual


def node_model_forward(x, edge_index, edge_attr, u, batch, params, *,
                       tile_n=128, edge_chunk=256, mxu_dtype=jnp.bfloat16):
    """Pallas implementation of NodeModel.forward (residuals=True, norm=False)."""
    w1, b1, w2, b2 = params
    N, node_in = x.shape
    E, F = edge_attr.shape
    gin = u.shape[1]
    hid = w1.shape[1]
    node_out = w2.shape[1]
    din = w1.shape[0]
    assert node_out == node_in, "residual connection requires node_out == node_in"
    assert din == node_in + 3 * F + gin
    assert tile_n % 8 == 0
    assert edge_chunk % 128 == 0

    n_pad = _round_up(N, tile_n)
    n_tiles = n_pad // tile_n

    # ---- host-side: sort edges by destination, build per-tile chunk schedule --------
    # TODO(synk): grid/padding are data-dependent, so this wrapper is not jit-able
    #             as-is; precompute the schedule once per graph for a jitted loop.
    col_host = np.asarray(edge_index[1], dtype=np.int32).reshape(-1)
    order_host = np.argsort(col_host, kind="stable").astype(np.int32)
    col_sorted_host = col_host[order_host]

    tile_lo = np.arange(n_tiles, dtype=np.int64) * tile_n
    starts = np.searchsorted(col_sorted_host, tile_lo, side="left")
    ends = np.searchsorted(col_sorted_host, tile_lo + tile_n, side="left")
    chunk_start = (starts // edge_chunk).astype(np.int32)
    chunk_end = np.where(ends > starts, (ends - 1) // edge_chunk + 1, chunk_start)
    chunk_count = (chunk_end - chunk_start).astype(np.int32)
    max_chunks = max(int(chunk_count.max()), 1)
    total_chunks = max(-(-max(E, 1) // edge_chunk),
                       int(chunk_start.max()) + max_chunks)
    e_pad = total_chunks * edge_chunk

    # ---- device-side operands --------------------------------------------------------
    # pre-packed [x | 0(sum) | 0(max) | 0(mean) | u[batch]] slab: one DMA per node tile
    ug = u[batch].astype(jnp.float32)
    slab = jnp.zeros((n_pad, din), jnp.float32)
    slab = slab.at[:N, :node_in].set(x.astype(jnp.float32))
    slab = slab.at[:N, node_in + 3 * F:].set(ug)

    order = jnp.asarray(order_host)
    ea_sorted = edge_attr.astype(jnp.float32)[order]                      # (E, F)
    col_p = jnp.full((1, e_pad), -1, jnp.int32)
    col_p = col_p.at[0, :E].set(jnp.asarray(col_sorted_host))             # pad = -1

    # edge_attr with a ones column appended (count folded into the scatter matmul)
    e_aug = jnp.concatenate([ea_sorted, jnp.ones((E, 1), jnp.float32)], axis=1)
    e_aug = jnp.pad(e_aug, ((0, e_pad - E), (0, 0))).astype(mxu_dtype)    # (e_pad, F+1)
    # transposed edge_attr for the lane-dense deferred-max path (f32: max is exact)
    e_t = jnp.pad(ea_sorted.T, ((0, 0), (0, e_pad - E)))                  # (F, e_pad)

    cs = jnp.asarray(chunk_start)     # (n_tiles,) int32, scalar-prefetched
    cc = jnp.asarray(chunk_count)     # (n_tiles,) int32, scalar-prefetched

    grid = (n_tiles, max_chunks)

    out = pl.pallas_call(
        _node_model_kernel,
        out_shape=jax.ShapeDtypeStruct((n_pad, node_out), jnp.float32),
        grid_spec=pltpu.PrefetchScalarGridSpec(
            num_scalar_prefetch=2,
            grid=grid,
            in_specs=[
                pl.BlockSpec((tile_n, din), lambda i, j, cs, cc: (i, 0)),          # slab
                pl.BlockSpec((1, edge_chunk),
                             lambda i, j, cs, cc: (0, cs[i] + j)),                 # col chunk
                pl.BlockSpec((edge_chunk, F + 1),
                             lambda i, j, cs, cc: (cs[i] + j, 0)),                 # [edge_attr | 1]
                pl.BlockSpec((F, edge_chunk),
                             lambda i, j, cs, cc: (0, cs[i] + j)),                 # edge_attr^T
                pl.BlockSpec((din, hid), lambda i, j, cs, cc: (0, 0)),             # W1
                pl.BlockSpec((1, hid), lambda i, j, cs, cc: (0, 0)),               # b1
                pl.BlockSpec((hid, node_out), lambda i, j, cs, cc: (0, 0)),        # W2
                pl.BlockSpec((1, node_out), lambda i, j, cs, cc: (0, 0)),          # b2
            ],
            out_specs=pl.BlockSpec((tile_n, node_out), lambda i, j, cs, cc: (i, 0)),
            scratch_shapes=[
                pltpu.VMEM((tile_n, F + 1), jnp.float32),          # running [sum | count]
                pltpu.VMEM((F, tile_n, edge_chunk), jnp.float32),  # un-reduced running max
                pltpu.VMEM((tile_n, din), jnp.float32),            # packed concat features
            ]),
        compiler_params=pltpu.CompilerParams(
            dimension_semantics=("parallel", "arbitrary"),
            vmem_limit_bytes=32 * 1024 * 1024),
    )(cs, cc, slab, col_p, e_aug, e_t, w1, b1, w2, b2)
    return out[:N]


def node_model_reference(x, edge_index, edge_attr, u, batch, params):
    """Pure-JAX reference of the PyTorch forward."""
    w1, b1, w2, b2 = params
    col = edge_index[1]
    N = x.shape[0]
    out1 = jax.ops.segment_sum(edge_attr, col, N)
    cnt = jax.ops.segment_sum(jnp.ones((edge_attr.shape[0], 1)), col, N)
    out2 = jax.ops.segment_max(edge_attr, col, N)
    out2 = jnp.where(cnt > 0.0, out2, 0.0)
    out3 = out1 / jnp.maximum(cnt, 1.0)
    feat = jnp.concatenate([x, out1, out2, out3, u[batch]], axis=1)
    h = jnp.maximum(feat @ w1 + b1, 0.0)
    return h @ w2 + b2 + x


def init_params(key, node_in, node_out, edge_out, hidden, global_in):
    """Deterministic Linear-style init (uniform +-1/sqrt(fan_in))."""
    din = node_in + 3 * edge_out + global_in
    k1, k2, k3, k4 = jax.random.split(key, 4)
    lim1 = 1.0 / np.sqrt(din)
    lim2 = 1.0 / np.sqrt(hidden)
    w1 = jax.random.uniform(k1, (din, hidden), jnp.float32, -lim1, lim1)
    b1 = jax.random.uniform(k2, (1, hidden), jnp.float32, -lim1, lim1)
    w2 = jax.random.uniform(k3, (hidden, node_out), jnp.float32, -lim2, lim2)
    b2 = jax.random.uniform(k4, (1, node_out), jnp.float32, -lim2, lim2)
    return (w1, b1, w2, b2)


if __name__ == "__main__":
    node_in = node_out = 8      # residual requires node_in == node_out
    edge_out = 8                # edge_attr feature width
    global_in = 2
    hidden = 32

    key = jax.random.PRNGKey(0)
    kp, kg1, kg2 = jax.random.split(key, 3)
    params = init_params(kp, node_in, node_out, edge_out, hidden, global_in)

    # ---- graph 1: 24 nodes, 40 edges, every node has >=1 incoming edge -------------
    N1, E1 = 24, 40
    kx, ke, kr, kc, ku = jax.random.split(kg1, 5)
    x1 = jax.random.normal(kx, (N1, node_in), jnp.float32)
    ea1 = jax.random.normal(ke, (E1, edge_out), jnp.float32)
    row1 = jax.random.randint(kr, (E1,), 0, N1, jnp.int32)
    col1 = jnp.concatenate([jnp.arange(N1, dtype=jnp.int32),
                            jax.random.randint(kc, (E1 - N1,), 0, N1, jnp.int32)])
    ei1 = jnp.stack([row1, col1])
    u1 = jax.random.normal(ku, (2, global_in), jnp.float32)
    batch1 = jnp.concatenate([jnp.zeros(N1 // 2, jnp.int32),
                              jnp.ones(N1 - N1 // 2, jnp.int32)])
    ref1 = node_model_reference(x1, ei1, ea1, u1, batch1, params)

    # tile_n=16 -> 2 node tiles (keeps both v7x TensorCores busy on small graphs)
    out1 = jax.block_until_ready(
        node_model_forward(x1, ei1, ea1, u1, batch1, params, tile_n=16))
    np.testing.assert_allclose(np.asarray(out1), np.asarray(ref1),
                               rtol=5e-2, atol=5e-2)          # bf16 MXU path

    out1_f32 = jax.block_until_ready(
        node_model_forward(x1, ei1, ea1, u1, batch1, params, tile_n=16,
                           mxu_dtype=jnp.float32))
    np.testing.assert_allclose(np.asarray(out1_f32), np.asarray(ref1),
                               rtol=1e-4, atol=1e-4)          # f32 MXU path

    # ---- graph 2: exercises multiple node tiles AND multiple edge chunks per tile ---
    N2, E2 = 40, 300
    kx, ke, kr, kc, ku = jax.random.split(kg2, 5)
    x2 = jax.random.normal(kx, (N2, node_in), jnp.float32)
    ea2 = jax.random.normal(ke, (E2, edge_out), jnp.float32)
    row2 = jax.random.randint(kr, (E2,), 0, N2, jnp.int32)
    col2 = jax.random.randint(kc, (E2,), 0, N2, jnp.int32)
    ei2 = jnp.stack([row2, col2])
    u2 = jax.random.normal(ku, (2, global_in), jnp.float32)
    batch2 = jnp.concatenate([jnp.zeros(20, jnp.int32), jnp.ones(N2 - 20, jnp.int32)])
    ref2 = node_model_reference(x2, ei2, ea2, u2, batch2, params)

    out2 = jax.block_until_ready(
        node_model_forward(x2, ei2, ea2, u2, batch2, params,
                           tile_n=16, edge_chunk=128, mxu_dtype=jnp.float32))
    np.testing.assert_allclose(np.asarray(out2), np.asarray(ref2),
                               rtol=1e-4, atol=1e-4)

    print("KERNEL_OK")
</pallas_src>

<mosaic_0001>
module attributes {stable_mosaic.version = 11 : i64} {
  func.func @_node_model_kernel(%arg0: i32, %arg1: i32, %arg2: memref<2xi32, #tpu.memory_space<smem>>, %arg3: memref<2xi32, #tpu.memory_space<smem>>, %arg4: memref<16x34xf32, #tpu.memory_space<vmem>>, %arg5: memref<1x256xi32, #tpu.memory_space<vmem>>, %arg6: memref<256x9xbf16, #tpu.memory_space<vmem>>, %arg7: memref<8x256xf32, #tpu.memory_space<vmem>>, %arg8: memref<34x32xf32, #tpu.memory_space<vmem>>, %arg9: memref<1x32xf32, #tpu.memory_space<vmem>>, %arg10: memref<32x8xf32, #tpu.memory_space<vmem>>, %arg11: memref<1x8xf32, #tpu.memory_space<vmem>>, %arg12: memref<16x8xf32, #tpu.memory_space<vmem>>, %arg13: memref<16x9xf32, #tpu.memory_space<vmem>>, %arg14: memref<8x16x256xf32, #tpu.memory_space<vmem>>, %arg15: memref<16x34xf32, #tpu.memory_space<vmem>>) attributes {dimension_semantics = [#tpu.dimension_semantics<parallel>, #tpu.dimension_semantics<arbitrary>], iteration_bounds = array<i64: 2, 1>, scalar_prefetch = 2 : i64, scratch_operands = 3 : i64, tpu.core_type = #tpu.core_type<tc>, window_params = [{transform_indices = @transform_0, window_bounds = array<i64: 16, 34>}, {transform_indices = @transform_1, window_bounds = array<i64: 1, 256>}, {transform_indices = @transform_2, window_bounds = array<i64: 256, 9>}, {transform_indices = @transform_3, window_bounds = array<i64: 8, 256>}, {pipeline_mode = #tpu.pipeline_mode<synchronous>, transform_indices = @transform_4, window_bounds = array<i64: 34, 32>}, {pipeline_mode = #tpu.pipeline_mode<synchronous>, transform_indices = @transform_5, window_bounds = array<i64: 1, 32>}, {pipeline_mode = #tpu.pipeline_mode<synchronous>, transform_indices = @transform_6, window_bounds = array<i64: 32, 8>}, {pipeline_mode = #tpu.pipeline_mode<synchronous>, transform_indices = @transform_7, window_bounds = array<i64: 1, 8>}, {transform_indices = @transform_8, window_bounds = array<i64: 16, 8>}]} {
    %c0_i32 = arith.constant 0 : i32
    %0 = arith.cmpi eq, %arg1, %c0_i32 : i32
    %1 = arith.extui %0 : i1 to i32
    %cst = arith.constant 0xFF800000 : f32
    %c0_i32_0 = arith.constant 0 : i32
    %2 = arith.cmpi ne, %1, %c0_i32_0 : i32
    scf.if %2 {
      %cst_5 = arith.constant 0.000000e+00 : f32
      %11 = vector.broadcast %cst_5 : f32 to vector<16x9xf32>
      %c0 = arith.constant 0 : index
      %c0_6 = arith.constant 0 : index
      %12 = vector.load %arg13[%c0, %c0_6] : memref<16x9xf32, #tpu.memory_space<vmem>>, vector<16x9xf32>
      tpu.vector_store %arg13[%c0, %c0_6], %11 {strides = array<i32>} : memref<16x9xf32, #tpu.memory_space<vmem>>, vector<16x9xf32>,
      %13 = vector.broadcast %cst : f32 to vector<8x16x256xf32>
      %c0_7 = arith.constant 0 : index
      %c0_8 = arith.constant 0 : index
      %c0_9 = arith.constant 0 : index
      %14 = vector.load %arg14[%c0_7, %c0_8, %c0_9] : memref<8x16x256xf32, #tpu.memory_space<vmem>>, vector<8x16x256xf32>
      tpu.vector_store %arg14[%c0_7, %c0_8, %c0_9], %13 {strides = array<i32>} : memref<8x16x256xf32, #tpu.memory_space<vmem>>, vector<8x16x256xf32>,
    } else {
    }
    %3 = arith.index_cast %arg0 : i32 to index
    %4 = memref.load %arg3[%3] : memref<2xi32, #tpu.memory_space<smem>>
    %5 = arith.cmpi slt, %arg1, %4 : i32
    %6 = arith.extui %5 : i1 to i32
    %cst_1 = arith.constant 0xFF800000 : f32
    %c0_i32_2 = arith.constant 0 : i32
    %7 = arith.cmpi ne, %6, %c0_i32_2 : i32
    scf.if %7 {
      %c16_i32 = arith.constant 16 : i32
      %11 = arith.muli %arg0, %c16_i32 : i32
      %c0 = arith.constant 0 : index
      %c0_5 = arith.constant 0 : index
      %12 = vector.load %arg5[%c0, %c0_5] : memref<1x256xi32, #tpu.memory_space<vmem>>, vector<1x256xi32>
      %13 = vector.broadcast %11 : i32 to vector<1x256xi32>
      %14 = arith.subi %12, %13 : vector<1x256xi32>
      %15 = tpu.iota {dimensions = array<i32: 0>} : vector<16x256xi32>
      %16 = vector.broadcast %14 : vector<1x256xi32> to vector<16x256xi32>
      %17 = arith.cmpi eq, %15, %16 : vector<16x256xi32>
      %18 = arith.extui %17 : vector<16x256xi1> to vector<16x256xi32>
      %19 = arith.sitofp %18 : vector<16x256xi32> to vector<16x256xf32>
      %20 = arith.truncf %19 : vector<16x256xf32> to vector<16x256xbf16>
      %c0_6 = arith.constant 0 : index
      %c0_7 = arith.constant 0 : index
      %21 = vector.load %arg13[%c0_6, %c0_7] : memref<16x9xf32, #tpu.memory_space<vmem>>, vector<16x9xf32>
      %c0_8 = arith.constant 0 : index
      %c0_9 = arith.constant 0 : index
      %22 = vector.load %arg6[%c0_8, %c0_9] : memref<256x9xbf16, #tpu.memory_space<vmem>>, vector<256x9xbf16>
      %cst_10 = arith.constant dense<0.000000e+00> : vector<16x9xf32>
      %23 = tpu.matmul %20, %22, %cst_10 {dimension_numbers = #tpu.dot_dimension_numbers<[1], [0], [0], [1], [0, 0, 1, 1], [], []>} : vector<16x256xbf16>, vector<256x9xbf16>, vector<16x9xf32> -> vector<16x9xf32>
      %24 = arith.addf %21, %23 : vector<16x9xf32>
      %c0_11 = arith.constant 0 : index
      %c0_12 = arith.constant 0 : index
      %25 = vector.load %arg13[%c0_11, %c0_12] : memref<16x9xf32, #tpu.memory_space<vmem>>, vector<16x9xf32>
      tpu.vector_store %arg13[%c0_11, %c0_12], %24 {strides = array<i32>} : memref<16x9xf32, #tpu.memory_space<vmem>>, vector<16x9xf32>,
      %c0_13 = arith.constant 0 : index
      %c0_14 = arith.constant 0 : index
      %26 = vector.load %arg7[%c0_13, %c0_14] : memref<8x256xf32, #tpu.memory_space<vmem>>, vector<8x256xf32>
      %27 = vector.extract_strided_slice %26 {offsets = [0, 0], sizes = [1, 256], strides = [1, 1]} : vector<8x256xf32> to vector<1x256xf32>
      %28 = vector.shape_cast %27 : vector<1x256xf32> to vector<1x256xf32>
      %29 = vector.broadcast %28 : vector<1x256xf32> to vector<16x256xf32>
      %30 = vector.broadcast %cst_1 : f32 to vector<16x256xf32>
      %31 = arith.select %17, %29, %30 : vector<16x256xi1>, vector<16x256xf32>
      %c0_15 = arith.constant 0 : index
      %c0_16 = arith.constant 0 : index
      %c0_17 = arith.constant 0 : index
      %32 = vector.load %arg14[%c0_15, %c0_16, %c0_17] : memref<8x16x256xf32, #tpu.memory_space<vmem>>, vector<1x16x256xf32>
      %33 = vector.shape_cast %32 : vector<1x16x256xf32> to vector<16x256xf32>
      %34 = arith.maximumf %33, %31 : vector<16x256xf32>
      %c0_18 = arith.constant 0 : index
      %c0_19 = arith.constant 0 : index
      %c0_20 = arith.constant 0 : index
      %35 = vector.load %arg14[%c0_18, %c0_19, %c0_20] : memref<8x16x256xf32, #tpu.memory_space<vmem>>, vector<1x16x256xf32>
      %36 = vector.shape_cast %35 : vector<1x16x256xf32> to vector<16x256xf32>
      %37 = vector.shape_cast %34 : vector<16x256xf32> to vector<1x16x256xf32>
      tpu.vector_store %arg14[%c0_18, %c0_19, %c0_20], %37 {strides = array<i32>} : memref<8x16x256xf32, #tpu.memory_space<vmem>>, vector<1x16x256xf32>,
      %38 = vector.extract_strided_slice %26 {offsets = [1, 0], sizes = [1, 256], strides = [1, 1]} : vector<8x256xf32> to vector<1x256xf32>
      %39 = vector.shape_cast %38 : vector<1x256xf32> to vector<1x256xf32>
      %40 = vector.broadcast %39 : vector<1x256xf32> to vector<16x256xf32>
      %41 = vector.broadcast %cst_1 : f32 to vector<16x256xf32>
      %42 = arith.select %17, %40, %41 : vector<16x256xi1>, vector<16x256xf32>
      %c1 = arith.constant 1 : index
      %c0_21 = arith.constant 0 : index
      %c0_22 = arith.constant 0 : index
      %43 = vector.load %arg14[%c1, %c0_21, %c0_22] : memref<8x16x256xf32, #tpu.memory_space<vmem>>, vector<1x16x256xf32>
      %44 = vector.shape_cast %43 : vector<1x16x256xf32> to vector<16x256xf32>
      %45 = arith.maximumf %44, %42 : vector<16x256xf32>
      %c1_23 = arith.constant 1 : index
      %c0_24 = arith.constant 0 : index
      %c0_25 = arith.constant 0 : index
      %46 = vector.load %arg14[%c1_23, %c0_24, %c0_25] : memref<8x16x256xf32, #tpu.memory_space<vmem>>, vector<1x16x256xf32>
      %47 = vector.shape_cast %46 : vector<1x16x256xf32> to vector<16x256xf32>
      %48 = vector.shape_cast %45 : vector<16x256xf32> to vector<1x16x256xf32>
      tpu.vector_store %arg14[%c1_23, %c0_24, %c0_25], %48 {strides = array<i32>} : memref<8x16x256xf32, #tpu.memory_space<vmem>>, vector<1x16x256xf32>,
      %49 = vector.extract_strided_slice %26 {offsets = [2, 0], sizes = [1, 256], strides = [1, 1]} : vector<8x256xf32> to vector<1x256xf32>
      %50 = vector.shape_cast %49 : vector<1x256xf32> to vector<1x256xf32>
      %51 = vector.broadcast %50 : vector<1x256xf32> to vector<16x256xf32>
      %52 = vector.broadcast %cst_1 : f32 to vector<16x256xf32>
      %53 = arith.select %17, %51, %52 : vector<16x256xi1>, vector<16x256xf32>
      %c2 = arith.constant 2 : index
      %c0_26 = arith.constant 0 : index
      %c0_27 = arith.constant 0 : index
      %54 = vector.load %arg14[%c2, %c0_26, %c0_27] : memref<8x16x256xf32, #tpu.memory_space<vmem>>, vector<1x16x256xf32>
      %55 = vector.shape_cast %54 : vector<1x16x256xf32> to vector<16x256xf32>
      %56 = arith.maximumf %55, %53 : vector<16x256xf32>
      %c2_28 = arith.constant 2 : index
      %c0_29 = arith.constant 0 : index
      %c0_30 = arith.constant 0 : index
      %57 = vector.load %arg14[%c2_28, %c0_29, %c0_30] : memref<8x16x256xf32, #tpu.memory_space<vmem>>, vector<1x16x256xf32>
      %58 = vector.shape_cast %57 : vector<1x16x256xf32> to vector<16x256xf32>
      %59 = vector.shape_cast %56 : vector<16x256xf32> to vector<1x16x256xf32>
      tpu.vector_store %arg14[%c2_28, %c0_29, %c0_30], %59 {strides = array<i32>} : memref<8x16x256xf32, #tpu.memory_space<vmem>>, vector<1x16x256xf32>,
      %60 = vector.extract_strided_slice %26 {offsets = [3, 0], sizes = [1, 256], strides = [1, 1]} : vector<8x256xf32> to vector<1x256xf32>
      %61 = vector.shape_cast %60 : vector<1x256xf32> to vector<1x256xf32>
      %62 = vector.broadcast %61 : vector<1x256xf32> to vector<16x256xf32>
      %63 = vector.broadcast %cst_1 : f32 to vector<16x256xf32>
      %64 = arith.select %17, %62, %63 : vector<16x256xi1>, vector<16x256xf32>
      %c3 = arith.constant 3 : index
      %c0_31 = arith.constant 0 : index
      %c0_32 = arith.constant 0 : index
      %65 = vector.load %arg14[%c3, %c0_31, %c0_32] : memref<8x16x256xf32, #tpu.memory_space<vmem>>, vector<1x16x256xf32>
      %66 = vector.shape_cast %65 : vector<1x16x256xf32> to vector<16x256xf32>
      %67 = arith.maximumf %66, %64 : vector<16x256xf32>
      %c3_33 = arith.constant 3 : index
      %c0_34 = arith.constant 0 : index
      %c0_35 = arith.constant 0 : index
      %68 = vector.load %arg14[%c3_33, %c0_34, %c0_35] : memref<8x16x256xf32, #tpu.memory_space<vmem>>, vector<1x16x256xf32>
      %69 = vector.shape_cast %68 : vector<1x16x256xf32> to vector<16x256xf32>
      %70 = vector.shape_cast %67 : vector<16x256xf32> to vector<1x16x256xf32>
      tpu.vector_store %arg14[%c3_33, %c0_34, %c0_35], %70 {strides = array<i32>} : memref<8x16x256xf32, #tpu.memory_space<vmem>>, vector<1x16x256xf32>,
      %71 = vector.extract_strided_slice %26 {offsets = [4, 0], sizes = [1, 256], strides = [1, 1]} : vector<8x256xf32> to vector<1x256xf32>
      %72 = vector.shape_cast %71 : vector<1x256xf32> to vector<1x256xf32>
      %73 = vector.broadcast %72 : vector<1x256xf32> to vector<16x256xf32>
      %74 = vector.broadcast %cst_1 : f32 to vector<16x256xf32>
      %75 = arith.select %17, %73, %74 : vector<16x256xi1>, vector<16x256xf32>
      %c4 = arith.constant 4 : index
      %c0_36 = arith.constant 0 : index
      %c0_37 = arith.constant 0 : index
      %76 = vector.load %arg14[%c4, %c0_36, %c0_37] : memref<8x16x256xf32, #tpu.memory_space<vmem>>, vector<1x16x256xf32>
      %77 = vector.shape_cast %76 : vector<1x16x256xf32> to vector<16x256xf32>
      %78 = arith.maximumf %77, %75 : vector<16x256xf32>
      %c4_38 = arith.constant 4 : index
      %c0_39 = arith.constant 0 : index
      %c0_40 = arith.constant 0 : index
      %79 = vector.load %arg14[%c4_38, %c0_39, %c0_40] : memref<8x16x256xf32, #tpu.memory_space<vmem>>, vector<1x16x256xf32>
      %80 = vector.shape_cast %79 : vector<1x16x256xf32> to vector<16x256xf32>
      %81 = vector.shape_cast %78 : vector<16x256xf32> to vector<1x16x256xf32>
      tpu.vector_store %arg14[%c4_38, %c0_39, %c0_40], %81 {strides = array<i32>} : memref<8x16x256xf32, #tpu.memory_space<vmem>>, vector<1x16x256xf32>,
      %82 = vector.extract_strided_slice %26 {offsets = [5, 0], sizes = [1, 256], strides = [1, 1]} : vector<8x256xf32> to vector<1x256xf32>
      %83 = vector.shape_cast %82 : vector<1x256xf32> to vector<1x256xf32>
      %84 = vector.broadcast %83 : vector<1x256xf32> to vector<16x256xf32>
      %85 = vector.broadcast %cst_1 : f32 to vector<16x256xf32>
      %86 = arith.select %17, %84, %85 : vector<16x256xi1>, vector<16x256xf32>
      %c5 = arith.constant 5 : index
      %c0_41 = arith.constant 0 : index
      %c0_42 = arith.constant 0 : index
      %87 = vector.load %arg14[%c5, %c0_41, %c0_42] : memref<8x16x256xf32, #tpu.memory_space<vmem>>, vector<1x16x256xf32>
      %88 = vector.shape_cast %87 : vector<1x16x256xf32> to vector<16x256xf32>
      %89 = arith.maximumf %88, %86 : vector<16x256xf32>
      %c5_43 = arith.constant 5 : index
      %c0_44 = arith.constant 0 : index
      %c0_45 = arith.constant 0 : index
      %90 = vector.load %arg14[%c5_43, %c0_44, %c0_45] : memref<8x16x256xf32, #tpu.memory_space<vmem>>, vector<1x16x256xf32>
      %91 = vector.shape_cast %90 : vector<1x16x256xf32> to vector<16x256xf32>
      %92 = vector.shape_cast %89 : vector<16x256xf32> to vector<1x16x256xf32>
      tpu.vector_store %arg14[%c5_43, %c0_44, %c0_45], %92 {strides = array<i32>} : memref<8x16x256xf32, #tpu.memory_space<vmem>>, vector<1x16x256xf32>,
      %93 = vector.extract_strided_slice %26 {offsets = [6, 0], sizes = [1, 256], strides = [1, 1]} : vector<8x256xf32> to vector<1x256xf32>
      %94 = vector.shape_cast %93 : vector<1x256xf32> to vector<1x256xf32>
      %95 = vector.broadcast %94 : vector<1x256xf32> to vector<16x256xf32>
      %96 = vector.broadcast %cst_1 : f32 to vector<16x256xf32>
      %97 = arith.select %17, %95, %96 : vector<16x256xi1>, vector<16x256xf32>
      %c6 = arith.constant 6 : index
      %c0_46 = arith.constant 0 : index
      %c0_47 = arith.constant 0 : index
      %98 = vector.load %arg14[%c6, %c0_46, %c0_47] : memref<8x16x256xf32, #tpu.memory_space<vmem>>, vector<1x16x256xf32>
      %99 = vector.shape_cast %98 : vector<1x16x256xf32> to vector<16x256xf32>
      %100 = arith.maximumf %99, %97 : vector<16x256xf32>
      %c6_48 = arith.constant 6 : index
      %c0_49 = arith.constant 0 : index
      %c0_50 = arith.constant 0 : index
      %101 = vector.load %arg14[%c6_48, %c0_49, %c0_50] : memref<8x16x256xf32, #tpu.memory_space<vmem>>, vector<1x16x256xf32>
      %102 = vector.shape_cast %101 : vector<1x16x256xf32> to vector<16x256xf32>
      %103 = vector.shape_cast %100 : vector<16x256xf32> to vector<1x16x256xf32>
      tpu.vector_store %arg14[%c6_48, %c0_49, %c0_50], %103 {strides = array<i32>} : memref<8x16x256xf32, #tpu.memory_space<vmem>>, vector<1x16x256xf32>,
      %104 = vector.extract_strided_slice %26 {offsets = [7, 0], sizes = [1, 256], strides = [1, 1]} : vector<8x256xf32> to vector<1x256xf32>
      %105 = vector.shape_cast %104 : vector<1x256xf32> to vector<1x256xf32>
      %106 = vector.broadcast %105 : vector<1x256xf32> to vector<16x256xf32>
      %107 = vector.broadcast %cst_1 : f32 to vector<16x256xf32>
      %108 = arith.select %17, %106, %107 : vector<16x256xi1>, vector<16x256xf32>
      %c7 = arith.constant 7 : index
      %c0_51 = arith.constant 0 : index
      %c0_52 = arith.constant 0 : index
      %109 = vector.load %arg14[%c7, %c0_51, %c0_52] : memref<8x16x256xf32, #tpu.memory_space<vmem>>, vector<1x16x256xf32>
      %110 = vector.shape_cast %109 : vector<1x16x256xf32> to vector<16x256xf32>
      %111 = arith.maximumf %110, %108 : vector<16x256xf32>
      %c7_53 = arith.constant 7 : index
      %c0_54 = arith.constant 0 : index
      %c0_55 = arith.constant 0 : index
      %112 = vector.load %arg14[%c7_53, %c0_54, %c0_55] : memref<8x16x256xf32, #tpu.memory_space<vmem>>, vector<1x16x256xf32>
      %113 = vector.shape_cast %112 : vector<1x16x256xf32> to vector<16x256xf32>
      %114 = vector.shape_cast %111 : vector<16x256xf32> to vector<1x16x256xf32>
      tpu.vector_store %arg14[%c7_53, %c0_54, %c0_55], %114 {strides = array<i32>} : memref<8x16x256xf32, #tpu.memory_space<vmem>>, vector<1x16x256xf32>,
    } else {
    }
    %c0_i32_3 = arith.constant 0 : i32
    %8 = arith.cmpi eq, %arg1, %c0_i32_3 : i32
    %9 = arith.extui %8 : i1 to i32
    %c0_i32_4 = arith.constant 0 : i32
    %10 = arith.cmpi ne, %9, %c0_i32_4 : i32
    scf.if %10 {
      %c0 = arith.constant 0 : index
      %c0_5 = arith.constant 0 : index
      %11 = vector.load %arg4[%c0, %c0_5] : memref<16x34xf32, #tpu.memory_space<vmem>>, vector<16x34xf32>
      %12 = vector.extract_strided_slice %11 {offsets = [0, 0], sizes = [16, 8], strides = [1, 1]} : vector<16x34xf32> to vector<16x8xf32>
      %c0_6 = arith.constant 0 : index
      %c0_7 = arith.constant 0 : index
      %13 = vector.load %arg13[%c0_6, %c0_7] : memref<16x9xf32, #tpu.memory_space<vmem>>, vector<16x9xf32>
      %14 = vector.extract_strided_slice %13 {offsets = [0, 0], sizes = [16, 8], strides = [1, 1]} : vector<16x9xf32> to vector<16x8xf32>
      %15 = vector.extract_strided_slice %13 {offsets = [0, 8], sizes = [16, 1], strides = [1, 1]} : vector<16x9xf32> to vector<16x1xf32>
      %cst_8 = arith.constant 1.000000e+00 : f32
      %16 = vector.broadcast %cst_8 : f32 to vector<16x1xf32>
      %17 = arith.maximumf %15, %16 : vector<16x1xf32>
      %18 = vector.broadcast %17 : vector<16x1xf32> to vector<16x8xf32>
      %19 = arith.divf %14, %18 : vector<16x8xf32>
      %c0_9 = arith.constant 0 : index
      %c0_10 = arith.constant 0 : index
      %c0_11 = arith.constant 0 : index
      %20 = vector.load %arg14[%c0_9, %c0_10, %c0_11] : memref<8x16x256xf32, #tpu.memory_space<vmem>>, vector<1x16x256xf32>
      %21 = vector.shape_cast %20 : vector<1x16x256xf32> to vector<16x256xf32>
      %cst_12 = arith.constant dense<0xFF800000> : vector<16xf32>
      %22 = vector.multi_reduction <maximumf>, %21, %cst_12 [1] : vector<16x256xf32> to vector<16xf32>
      %23 = vector.shape_cast %22 : vector<16xf32> to vector<16x1xf32>
      %c1 = arith.constant 1 : index
      %c0_13 = arith.constant 0 : index
      %c0_14 = arith.constant 0 : index
      %24 = vector.load %arg14[%c1, %c0_13, %c0_14] : memref<8x16x256xf32, #tpu.memory_space<vmem>>, vector<1x16x256xf32>
      %25 = vector.shape_cast %24 : vector<1x16x256xf32> to vector<16x256xf32>
      %cst_15 = arith.constant dense<0xFF800000> : vector<16xf32>
      %26 = vector.multi_reduction <maximumf>, %25, %cst_15 [1] : vector<16x256xf32> to vector<16xf32>
      %27 = vector.shape_cast %26 : vector<16xf32> to vector<16x1xf32>
      %c2 = arith.constant 2 : index
      %c0_16 = arith.constant 0 : index
      %c0_17 = arith.constant 0 : index
      %28 = vector.load %arg14[%c2, %c0_16, %c0_17] : memref<8x16x256xf32, #tpu.memory_space<vmem>>, vector<1x16x256xf32>
      %29 = vector.shape_cast %28 : vector<1x16x256xf32> to vector<16x256xf32>
      %cst_18 = arith.constant dense<0xFF800000> : vector<16xf32>
      %30 = vector.multi_reduction <maximumf>, %29, %cst_18 [1] : vector<16x256xf32> to vector<16xf32>
      %31 = vector.shape_cast %30 : vector<16xf32> to vector<16x1xf32>
      %c3 = arith.constant 3 : index
      %c0_19 = arith.constant 0 : index
      %c0_20 = arith.constant 0 : index
      %32 = vector.load %arg14[%c3, %c0_19, %c0_20] : memref<8x16x256xf32, #tpu.memory_space<vmem>>, vector<1x16x256xf32>
      %33 = vector.shape_cast %32 : vector<1x16x256xf32> to vector<16x256xf32>
      %cst_21 = arith.constant dense<0xFF800000> : vector<16xf32>
      %34 = vector.multi_reduction <maximumf>, %33, %cst_21 [1] : vector<16x256xf32> to vector<16xf32>
      %35 = vector.shape_cast %34 : vector<16xf32> to vector<16x1xf32>
      %c4 = arith.constant 4 : index
      %c0_22 = arith.constant 0 : index
      %c0_23 = arith.constant 0 : index
      %36 = vector.load %arg14[%c4, %c0_22, %c0_23] : memref<8x16x256xf32, #tpu.memory_space<vmem>>, vector<1x16x256xf32>
      %37 = vector.shape_cast %36 : vector<1x16x256xf32> to vector<16x256xf32>
      %cst_24 = arith.constant dense<0xFF800000> : vector<16xf32>
      %38 = vector.multi_reduction <maximumf>, %37, %cst_24 [1] : vector<16x256xf32> to vector<16xf32>
      %39 = vector.shape_cast %38 : vector<16xf32> to vector<16x1xf32>
      %c5 = arith.constant 5 : index
      %c0_25 = arith.constant 0 : index
      %c0_26 = arith.constant 0 : index
      %40 = vector.load %arg14[%c5, %c0_25, %c0_26] : memref<8x16x256xf32, #tpu.memory_space<vmem>>, vector<1x16x256xf32>
      %41 = vector.shape_cast %40 : vector<1x16x256xf32> to vector<16x256xf32>
      %cst_27 = arith.constant dense<0xFF800000> : vector<16xf32>
      %42 = vector.multi_reduction <maximumf>, %41, %cst_27 [1] : vector<16x256xf32> to vector<16xf32>
      %43 = vector.shape_cast %42 : vector<16xf32> to vector<16x1xf32>
      %c6 = arith.constant 6 : index
      %c0_28 = arith.constant 0 : index
      %c0_29 = arith.constant 0 : index
      %44 = vector.load %arg14[%c6, %c0_28, %c0_29] : memref<8x16x256xf32, #tpu.memory_space<vmem>>, vector<1x16x256xf32>
      %45 = vector.shape_cast %44 : vector<1x16x256xf32> to vector<16x256xf32>
      %cst_30 = arith.constant dense<0xFF800000> : vector<16xf32>
      %46 = vector.multi_reduction <maximumf>, %45, %cst_30 [1] : vector<16x256xf32> to vector<16xf32>
      %47 = vector.shape_cast %46 : vector<16xf32> to vector<16x1xf32>
      %c7 = arith.constant 7 : index
      %c0_31 = arith.constant 0 : index
      %c0_32 = arith.constant 0 : index
      %48 = vector.load %arg14[%c7, %c0_31, %c0_32] : memref<8x16x256xf32, #tpu.memory_space<vmem>>, vector<1x16x256xf32>
      %49 = vector.shape_cast %48 : vector<1x16x256xf32> to vector<16x256xf32>
      %cst_33 = arith.constant dense<0xFF800000> : vector<16xf32>
      %50 = vector.multi_reduction <maximumf>, %49, %cst_33 [1] : vector<16x256xf32> to vector<16xf32>
      %51 = vector.shape_cast %50 : vector<16xf32> to vector<16x1xf32>
      %52 = tpu.concatenate %23, %27, %31, %35, %39, %43, %47, %51 in 1 : vector<16x1xf32>, vector<16x1xf32>, vector<16x1xf32>, vector<16x1xf32>, vector<16x1xf32>, vector<16x1xf32>, vector<16x1xf32>, vector<16x1xf32> -> vector<16x8xf32>
      %cst_34 = arith.constant 0.000000e+00 : f32
      %53 = vector.broadcast %cst_34 : f32 to vector<16x1xf32>
      %54 = arith.cmpf ogt, %15, %53 : vector<16x1xf32>
      %cst_35 = arith.constant 0.000000e+00 : f32
      %55 = vector.shape_cast %54 : vector<16x1xi1> to vector<16x1xi1>
      %56 = vector.broadcast %55 : vector<16x1xi1> to vector<16x8xi1>
      %57 = vector.broadcast %cst_35 : f32 to vector<16x8xf32>
      %58 = arith.select %56, %52, %57 : vector<16x8xi1>, vector<16x8xf32>
      %c0_36 = arith.constant 0 : index
      %c0_37 = arith.constant 0 : index
      %59 = vector.load %arg15[%c0_36, %c0_37] : memref<16x34xf32, #tpu.memory_space<vmem>>, vector<16x34xf32>
      tpu.vector_store %arg15[%c0_36, %c0_37], %11 {strides = array<i32>} : memref<16x34xf32, #tpu.memory_space<vmem>>, vector<16x34xf32>,
      %c0_38 = arith.constant 0 : index
      %c8 = arith.constant 8 : index
      %60 = vector.load %arg15[%c0_38, %c8] : memref<16x34xf32, #tpu.memory_space<vmem>>, vector<16x8xf32>
      tpu.vector_store %arg15[%c0_38, %c8], %14 {strides = array<i32>} : memref<16x34xf32, #tpu.memory_space<vmem>>, vector<16x8xf32>,
      %c0_39 = arith.constant 0 : index
      %c16 = arith.constant 16 : index
      %61 = vector.load %arg15[%c0_39, %c16] : memref<16x34xf32, #tpu.memory_space<vmem>>, vector<16x8xf32>
      tpu.vector_store %arg15[%c0_39, %c16], %58 {strides = array<i32>} : memref<16x34xf32, #tpu.memory_space<vmem>>, vector<16x8xf32>,
      %c0_40 = arith.constant 0 : index
      %c24 = arith.constant 24 : index
      %62 = vector.load %arg15[%c0_40, %c24] : memref<16x34xf32, #tpu.memory_space<vmem>>, vector<16x8xf32>
      tpu.vector_store %arg15[%c0_40, %c24], %19 {strides = array<i32>} : memref<16x34xf32, #tpu.memory_space<vmem>>, vector<16x8xf32>,
      %c0_41 = arith.constant 0 : index
      %c0_42 = arith.constant 0 : index
      %63 = vector.load %arg15[%c0_41, %c0_42] : memref<16x34xf32, #tpu.memory_space<vmem>>, vector<16x34xf32>
      %c0_43 = arith.constant 0 : index
      %c0_44 = arith.constant 0 : index
      %64 = vector.load %arg8[%c0_43, %c0_44] : memref<34x32xf32, #tpu.memory_space<vmem>>, vector<34x32xf32>
      %cst_45 = arith.constant dense<0.000000e+00> : vector<16x32xf32>
      %65 = tpu.matmul %63, %64, %cst_45 {dimension_numbers = #tpu.dot_dimension_numbers<[1], [0], [0], [1], [0, 0, 1, 1], [], []>} : vector<16x34xf32>, vector<34x32xf32>, vector<16x32xf32> -> vector<16x32xf32>
      %c0_46 = arith.constant 0 : index
      %c0_47 = arith.constant 0 : index
      %66 = vector.load %arg9[%c0_46, %c0_47] : memref<1x32xf32, #tpu.memory_space<vmem>>, vector<1x32xf32>
      %67 = vector.broadcast %66 : vector<1x32xf32> to vector<16x32xf32>
      %68 = arith.addf %65, %67 : vector<16x32xf32>
      %cst_48 = arith.constant 0.000000e+00 : f32
      %69 = vector.broadcast %cst_48 : f32 to vector<16x32xf32>
      %70 = arith.maximumf %68, %69 : vector<16x32xf32>
      %c0_49 = arith.constant 0 : index
      %c0_50 = arith.constant 0 : index
      %71 = vector.load %arg10[%c0_49, %c0_50] : memref<32x8xf32, #tpu.memory_space<vmem>>, vector<32x8xf32>
      %cst_51 = arith.constant dense<0.000000e+00> : vector<16x8xf32>
      %72 = tpu.matmul %70, %71, %cst_51 {dimension_numbers = #tpu.dot_dimension_numbers<[1], [0], [0], [1], [0, 0, 1, 1], [], []>} : vector<16x32xf32>, vector<32x8xf32>, vector<16x8xf32> -> vector<16x8xf32>
      %c0_52 = arith.constant 0 : index
      %c0_53 = arith.constant 0 : index
      %73 = vector.load %arg11[%c0_52, %c0_53] : memref<1x8xf32, #tpu.memory_space<vmem>>, vector<1x8xf32>
      %74 = vector.broadcast %73 : vector<1x8xf32> to vector<16x8xf32>
      %75 = arith.addf %72, %74 : vector<16x8xf32>
      %76 = arith.addf %75, %12 : vector<16x8xf32>
      %c0_54 = arith.constant 0 : index
      %c0_55 = arith.constant 0 : index
      %77 = vector.load %arg12[%c0_54, %c0_55] : memref<16x8xf32, #tpu.memory_space<vmem>>, vector<16x8xf32>
      tpu.vector_store %arg12[%c0_54, %c0_55], %76 {strides = array<i32>} : memref<16x8xf32, #tpu.memory_space<vmem>>, vector<16x8xf32>,
    } else {
    }
    return
  }
  func.func @transform_0(%arg0: i32, %arg1: i32, %arg2: memref<2xi32, #tpu.memory_space<smem>>, %arg3: memref<2xi32, #tpu.memory_space<smem>>) -> (i32, i32) {
    %c0_i32 = arith.constant 0 : i32
    %c0_i32_0 = arith.constant 0 : i32
    return %arg0, %c0_i32 : i32, i32
  }
  func.func @transform_1(%arg0: i32, %arg1: i32, %arg2: memref<2xi32, #tpu.memory_space<smem>>, %arg3: memref<2xi32, #tpu.memory_space<smem>>) -> (i32, i32) {
    %0 = arith.index_cast %arg0 : i32 to index
    %1 = memref.load %arg2[%0] : memref<2xi32, #tpu.memory_space<smem>>
    %2 = arith.addi %1, %arg1 : i32
    %c0_i32 = arith.constant 0 : i32
    %c0_i32_0 = arith.constant 0 : i32
    return %c0_i32, %2 : i32, i32
  }
  func.func @transform_2(%arg0: i32, %arg1: i32, %arg2: memref<2xi32, #tpu.memory_space<smem>>, %arg3: memref<2xi32, #tpu.memory_space<smem>>) -> (i32, i32) {
    %0 = arith.index_cast %arg0 : i32 to index
    %1 = memref.load %arg2[%0] : memref<2xi32, #tpu.memory_space<smem>>
    %2 = arith.addi %1, %arg1 : i32
    %c0_i32 = arith.constant 0 : i32
    %c0_i32_0 = arith.constant 0 : i32
    return %2, %c0_i32 : i32, i32
  }
  func.func @transform_3(%arg0: i32, %arg1: i32, %arg2: memref<2xi32, #tpu.memory_space<smem>>, %arg3: memref<2xi32, #tpu.memory_space<smem>>) -> (i32, i32) {
    %0 = arith.index_cast %arg0 : i32 to index
    %1 = memref.load %arg2[%0] : memref<2xi32, #tpu.memory_space<smem>>
    %2 = arith.addi %1, %arg1 : i32
    %c0_i32 = arith.constant 0 : i32
    %c0_i32_0 = arith.constant 0 : i32
    return %c0_i32, %2 : i32, i32
  }
  func.func @transform_4(%arg0: i32, %arg1: i32, %arg2: memref<2xi32, #tpu.memory_space<smem>>, %arg3: memref<2xi32, #tpu.memory_space<smem>>) -> (i32, i32) {
    %c0_i32 = arith.constant 0 : i32
    %c0_i32_0 = arith.constant 0 : i32
    %c0_i32_1 = arith.constant 0 : i32
    return %c0_i32, %c0_i32_0 : i32, i32
  }
  func.func @transform_5(%arg0: i32, %arg1: i32, %arg2: memref<2xi32, #tpu.memory_space<smem>>, %arg3: memref<2xi32, #tpu.memory_space<smem>>) -> (i32, i32) {
    %c0_i32 = arith.constant 0 : i32
    %c0_i32_0 = arith.constant 0 : i32
    %c0_i32_1 = arith.constant 0 : i32
    return %c0_i32, %c0_i32_0 : i32, i32
  }
  func.func @transform_6(%arg0: i32, %arg1: i32, %arg2: memref<2xi32, #tpu.memory_space<smem>>, %arg3: memref<2xi32, #tpu.memory_space<smem>>) -> (i32, i32) {
    %c0_i32 = arith.constant 0 : i32
    %c0_i32_0 = arith.constant 0 : i32
    %c0_i32_1 = arith.constant 0 : i32
    return %c0_i32, %c0_i32_0 : i32, i32
  }
  func.func @transform_7(%arg0: i32, %arg1: i32, %arg2: memref<2xi32, #tpu.memory_space<smem>>, %arg3: memref<2xi32, #tpu.memory_space<smem>>) -> (i32, i32) {
    %c0_i32 = arith.constant 0 : i32
    %c0_i32_0 = arith.constant 0 : i32
    %c0_i32_1 = arith.constant 0 : i32
    return %c0_i32, %c0_i32_0 : i32, i32
  }
  func.func @transform_8(%arg0: i32, %arg1: i32, %arg2: memref<2xi32, #tpu.memory_space<smem>>, %arg3: memref<2xi32, #tpu.memory_space<smem>>) -> (i32, i32) {
    %c0_i32 = arith.constant 0 : i32
    %c0_i32_0 = arith.constant 0 : i32
    return %arg0, %c0_i32 : i32, i32
  }
}

</mosaic_0001>

<bundles_post_ra>
// kernel: tpu_custom_call.1
= control target key start
LH: loop header
LB: loop body
LE: loop exit
PB: predicated region body
PF: predicated region fallthrough
CT: control target
= control target key end

     0   :  { %s1992_s0 = inlined_call_operand.vmem [shape: s32[2], index: 0, kind: input, shape index: {}]   ;;  %s1993_s2 = inlined_call_operand.vmem [shape: f32[32,34], index: 2, kind: input, shape index: {}]   ;;  %s1994_s3 = inlined_call_operand.vmem [shape: s32[1,256], index: 3, kind: input, shape index: {}]   ;;  %s1995_s4 = inlined_call_operand.vmem [shape: bf16[256,9], index: 4, kind: input, shape index: {}]   ;;  %s1996_s5 = inlined_call_operand.vmem [shape: f32[8,256], index: 5, kind: input, shape index: {}]   ;;  %s1997_s6 = inlined_call_operand.vmem [shape: f32[34,32], index: 6, kind: input, shape index: {}]   ;;  %s1998_s7 = inlined_call_operand.vmem [shape: f32[1,32], index: 7, kind: input, shape index: {}]   ;;  %s1999_s8 = inlined_call_operand.vmem [shape: f32[32,8], index: 8, kind: input, shape index: {}]   ;;  %s2000_s9 = inlined_call_operand.vmem [shape: f32[1,8], index: 9, kind: input, shape index: {}]   ;;  %s2001_s10 = inlined_call_operand.vmem [shape: f32[32,8], index: 10, kind: output, shape index: {}]   ;;  %s2002_s1 = inlined_call_operand.vmem [shape: s32[2], index: 1, kind: input, shape index: {}]  }
   0x1   :  { %2003 = sst [smem:[#allocation10_spill]] %s1993_s2  ;;  %s15_s15 = sshll.u32 %s1992_s0, 4  ;;  %s16_s15 = int_to_ptr.vmem [resolvable:$true] %s15_s15 }
   0x2   :  { %s19_s18 = sshll.u32 %s2002_s1, 4  ;;  %s1532_s19 = scalar_lea.vmem %s16_s15, 16  ;;  %s20_s18 = int_to_ptr.vmem [resolvable:$true] %s19_s18 }
   0x3   :  { %p1533_p0 = scmp.ne.s32.totalorder %s16_s15, %s1532_s19  ;;  %p1537_p1 = scmp.lt.s32.totalorder %s16_s15, %s16_s15 }
   0x4   :  { %p1538_p2 = scmp.lt.s32.totalorder %s1532_s19, %s1532_s19 }
   0x6   :  { %p1539_p3 = por %p1538_p2, %p1537_p1 }
   0x8   :  { %p1540_p4 = pnand %p1539_p3, %p1533_p0 }
   0xa   :  { %1543 = shalt.err (!%p1540_p4)  }
   0xb   :  { %s1582_s20 = smov [#allocation6]   ;;  %s1544_s21 = scalar_lea.vmem %s20_s18, 16 }
   0xc   :  { %18 = dma.vmem_to_smem %s16_s15, 16, %s1582_s20, [#allocation5] }
   0xd   :  { %p1545_p5 = scmp.ne.s32.totalorder %s20_s18, %s1544_s21  ;;  %p1549_p6 = scmp.lt.s32.totalorder %s20_s18, %s20_s18 }
   0xe   :  { %p1550_p7 = scmp.lt.s32.totalorder %s1544_s21, %s1544_s21 }
  0x10   :  { %p1551_p8 = por %p1550_p7, %p1549_p6 }
  0x12   :  { %p1552_p9 = pnand %p1551_p8, %p1545_p5 }
  0x14   :  { %1555 = shalt.err (!%p1552_p9)  }
  0x15   :  { %s1583_s0 = smov [#allocation7]  }
  0x16   :  { %22 = dma.vmem_to_smem %s20_s18, 16, %s1583_s0, [#allocation5] }
  0x17   :  { %1568 = dma.done.wait [#allocation5], 32 }
  0x18   :  { %1569 = vsyncadd [#allocation5], 4294967264 }
  0x19   :  { %24 = sfence }
  0x1a   :  { %s1653_s1 = smov 0   ;;  %s1655_s22 = smov 0  }
  0x1b   :  { %s1657_s23 = smov 0  }
  0x1c LB: > { %s42_s24 = sadd.s32 1, %s1576_s22  ;;  %p1371_p10 = scmp.ge.s32.totalorder %s1580_s23, 1  ;;  %s1580_s23 = sphi %s1657_s23, %s30_s23   ;;  %s1576_s22 = sphi %s1655_s22, %s2017_s22   ;;  %s1572_s1 = sphi %s1653_s1, %s2016_s1  }
  0x1d   : > { %p44_p11 = scmp.ge.s32.totalorder %s42_s24, 2  ;;  %p343_p12 = scmp.lt.s32.totalorder %s1580_s23, 3 }
  0x1f   : > { %s2019_s24 = smov (%p44_p11, %s42_s24), 0  ;;  %p344_p13 = pnand %p1371_p10, %p343_p12 }
  0x20   : > { %2004 = sst [smem:[#allocation9_spill]] %s2019_s24  ;;  %s1372_s25 = sshll.u32 (!%p344_p13), %s1572_s1, 1 }
  0x21   : > { %347 = sbr.rel (%p344_p13) target bundleno = 1041 (0x411), region = 52  ;;  %s1675_s26 = sld [smem:[#allocation6 + %s1572_s1]] (!%p344_p13) }
  0x22   : > { %p1679_p0 = scmp.lt.s32.totalorder (!%p344_p13), %s1372_s25, 3  ;;  %s1684_s28 = sld [smem:[#allocation6 + %s1572_s1]] (!%p344_p13) }
  0x23   : > { %s422_s29 = sld [smem:[#allocation6 + %s1572_s1]] (!%p344_p13) }
  0x24   : > { %s478_s30 = sld [smem:[#allocation7 + %s1572_s1]] (!%p344_p13) }
  0x25   : > { %s2006_s2 = sld [smem:[#allocation10_spill]] (!%p344_p13) }
  0x26   : > { %vm443_vm0 = vcmask 72704   ;;  %v1584_v0 = vmov 0.0   ;;  %v1585_v1 = vmov -inf   ;;  %s2021_s25 = smov (!%p1679_p0, %s1372_s25), 3 }
  0x27   : > { %444 = vst.msk [vmem:[#allocation2] sm:$0xff] %vm443_vm0, %v1584_v0  ;;  %445 = vst.msk [vmem:[#allocation2 + $0x8] sm:$0xff] %vm443_vm0, %v1584_v0  ;;  %s1373_s11 = sshll.u32 %s2021_s25, 3  ;;  %s1374_s15 = sshll.u32 %s1675_s26, 1 }
  0x28   : > { %446 = vst [vmem:[#allocation3 + $0xb0] sm:$0xff] %v1585_v1  ;;  %447 = vst [vmem:[#allocation3] sm:$0xff] %v1585_v1  ;;  %p406_p1 = scmp.lt.s32.totalorder %s1374_s15, 1  ;;  %s1375_s16 = sshll.u32 %s1684_s28, 5 }
  0x29   : > { %448 = vst [vmem:[#allocation3 + $0xd8] sm:$0xff] %v1585_v1  ;;  %449 = vst [vmem:[#allocation3 + $0x18] sm:$0xff] %v1585_v1  ;;  %p415_p2 = scmp.lt.s32.totalorder %s1375_s16, 31  ;;  %s1377_s17 = sshll.u32 %s422_s29, 1 }
  0x2a   : > { %450 = vst [vmem:[#allocation3 + $0x50] sm:$0xff] %v1585_v1  ;;  %451 = vst [vmem:[#allocation3 + $0x68] sm:$0xff] %v1585_v1  ;;  %s2023_s15 = smov (!%p406_p1, %s1374_s15), 1  ;;  %p425_p3 = scmp.lt.s32.totalorder %s1377_s17, 1 }
  0x2b   : > { %452 = vst [vmem:[#allocation3 + $0x30] sm:$0xff] %v1585_v1  ;;  %453 = vst [vmem:[#allocation3 + $0x48] sm:$0xff] %v1585_v1  ;;  %s1697_s14 = scalar_lea.vmem %s2006_s2, %s1373_s11  ;;  %s2025_s16 = smov (!%p415_p2, %s1375_s16), 31 }
  0x2c   : > { %454 = vst [vmem:[#allocation3 + $0x80] sm:$0xff] %v1585_v1  ;;  %455 = vst [vmem:[#allocation3 + $0x88] sm:$0xff] %v1585_v1  ;;  %s408_s20 = scalar_lea.vmem %s1994_s3, %s2023_s15  ;;  %s1376_s21 = sshll.u32 %s2025_s16, 2 }
  0x2d   : > { %456 = vst [vmem:[#allocation3 + $0xe8] sm:$0xff] %v1585_v1  ;;  %457 = vst [vmem:[#allocation3 + $0xb8] sm:$0xff] %v1585_v1  ;;  %s1710_s27 = scalar_lea.vmem %s2001_s10, %s1373_s11  ;;  %s1715_s28 = scalar_lea.vmem %s1995_s4, %s1376_s21 }
  0x2e   : > { %458 = vst [vmem:[#allocation3 + $0x60] sm:$0xff] %v1585_v1  ;;  %459 = vst [vmem:[#allocation3 + $0xf0] sm:$0xff] %v1585_v1  ;;  %s2027_s17 = smov (!%p425_p3, %s1377_s17), 1  ;;  %p1382_p4 = scmp.le.s32.totalorder %s478_s30, 0 }
  0x2f   : > { %460 = vst [vmem:[#allocation3 + $0x8] sm:$0xff] %v1585_v1  ;;  %461 = vst [vmem:[#allocation3 + $0x78] sm:$0xff] %v1585_v1  ;;  %s1378_s29 = sshll.u32 %s2027_s17, 3  ;;  %s1383_s2 = sshll.u32 (!%p1382_p4), %s1572_s1, 4 }
  0x30   : > { %462 = vst [vmem:[#allocation3 + $0x38] sm:$0xff] %v1585_v1  ;;  %463 = vst [vmem:[#allocation3 + $0x58] sm:$0xff] %v1585_v1  ;;  %s1720_s24 = scalar_lea.vmem %s1996_s5, %s1378_s29 }
  0x31   : > { %464 = vst [vmem:[#allocation3 + $0x40] sm:$0xff] %v1585_v1  ;;  %465 = vst [vmem:[#allocation3 + $0xc8] sm:$0xff] %v1585_v1 }
  0x32   : > { %466 = vst [vmem:[#allocation3 + $0xe0] sm:$0xff] %v1585_v1  ;;  %467 = vst [vmem:[#allocation3 + $0x90] sm:$0xff] %v1585_v1 }
  0x33   : > { %468 = vst [vmem:[#allocation3 + $0x70] sm:$0xff] %v1585_v1  ;;  %469 = vst [vmem:[#allocation3 + $0xc0] sm:$0xff] %v1585_v1  ;;  %482 = sbr.rel (%p1382_p4) target bundleno = 293 (0x125), region = 60 }
  0x34   : > { %470 = vst [vmem:[#allocation3 + $0xa8] sm:$0xff] %v1585_v1  ;;  %471 = vst [vmem:[#allocation3 + $0xd0] sm:$0xff] %v1585_v1 }
  0x35   : > { %472 = vst [vmem:[#allocation3 + $0x10] sm:$0xff] %v1585_v1  ;;  %473 = vst [vmem:[#allocation3 + $0x28] sm:$0xff] %v1585_v1 }
  0x36   : > { %474 = vst [vmem:[#allocation3 + $0xa0] sm:$0xff] %v1585_v1  ;;  %475 = vst [vmem:[#allocation3 + $0xf8] sm:$0xff] %v1585_v1 }
  0x37   : > { %476 = vst [vmem:[#allocation3 + $0x20] sm:$0xff] %v1585_v1  ;;  %477 = vst [vmem:[#allocation3 + $0x98] sm:$0xff] %v1585_v1 }
  0x38   : > { %v1510_v2 = vld [vmem:[%s1715_s28 + $0x78] sm:$0xff]   ;;  %v1512_v4 = vld [vmem:[%s1715_s28 + $0x70] sm:$0xff]   ;;  %v487_v5 = vlaneseq  ;;  %v1514_v7 = vld [vmem:[%s1715_s28 + $0x68] sm:$0xff]   ;;  %v485_v21 = vstv %s1383_s2  ;;  %v1586_v62 = vmov 1.0|1.0  }
  0x39   : > { %v1511_v3 = vld [vmem:[%s1715_s28 + $0x38] sm:$0xff]   ;;  %1417 = vmatprep.subr.bf16.mxu0 %v1510_v2  ;;  %v1513_v6 = vld [vmem:[%s1715_s28 + $0x30] sm:$0xff]   ;;  %v1515_v9 = vld [vmem:[%s1715_s28 + $0x28] sm:$0xff]  }
  0x3a   : > { %1418 = vmatpush3.bf16.msra.mxu0 %v1511_v3  ;;  %v1727_v8 = vshrl.u32 %v487_v5, 7  ;;  %v1516_v10 = vld [vmem:[%s1715_s28 + $0x60] sm:$0xff]   ;;  %v1518_v16 = vld [vmem:[%s1715_s28 + $0x58] sm:$0xff]   ;;  %v1520_v20 = vld [vmem:[%s1715_s28 + $0x50] sm:$0xff]  }
  0x3b   : > { %1419 = vmatprep.subr.bf16.mxu0 %v1512_v4  ;;  %v1517_v14 = vld [vmem:[%s1715_s28 + $0x20] sm:$0xff]   ;;  %v1519_v18 = vld [vmem:[%s1715_s28 + $0x18] sm:$0xff]   ;;  %v689_v27 = vld [vmem:[%s1720_s24 + $0x8] sm:$0xff] }
  0x3c   : > { %v489_v11 = vadd.s32 8, %v1727_v8  ;;  %v496_v12 = vsub.s32 1, %v1727_v8  ;;  %v741_v13 = vsub.s32 2, %v1727_v8  ;;  %v766_v15 = vsub.s32 3, %v1727_v8  ;;  %v484_v25 = vld [vmem:[%s408_s20] sm:$0x3] }
  0x3d   : > { %v791_v17 = vsub.s32 4, %v1727_v8  ;;  %v816_v19 = vsub.s32 5, %v1727_v8  ;;  %v841_v22 = vsub.s32 6, %v1727_v8  ;;  %v866_v23 = vsub.s32 7, %v1727_v8  ;;  %v1751_v26 = vld [vmem:[%s1720_s24] sm:$0xff]  ;;  %v1521_v36 = vld [vmem:[%s1715_s28 + $0x10] sm:$0xff]  }
  0x3e   : > { %1420 = vmatpush3.bf16.msra.mxu0 %v1513_v6  ;;  %v492_v24 = vsub.s32 0, %v1727_v8  ;;  %v486_v28 = vsub.s32 %v484_v25, %v485_v21  ;;  %v1755_v29 = vrot.slane %v1751_v26, %v496_v12  ;;  %v721_v30 = vrot.slane %v689_v27, %v496_v12  ;;  %v1522_v37 = vld [vmem:[%s1715_s28 + $0x48] sm:$0xff]   ;;  %v728_v42 = vld [vmem:[#allocation3 + $0x68] sm:$0xff]  ;;  %v778_v52 = vld [vmem:[#allocation3 + $0xf0] sm:$0xff] }
  0x3f   : > { %1421 = vmatprep.subr.bf16.mxu0 %v1514_v7  ;;  %v746_v31 = vrot.slane %v689_v27, %v741_v13  ;;  %v771_v32 = vrot.slane %v689_v27, %v766_v15  ;;  %v796_v33 = vrot.slane %v689_v27, %v791_v17  ;;  %v1759_v34 = vrot.slane %v689_v27, %v816_v19  ;;  %v730_v43 = vld [vmem:[#allocation3 + $0x48] sm:$0xff]  ;;  %v755_v51 = vld [vmem:[#allocation3 + $0xb8] sm:$0xff]  ;;  %v828_v4 = vld [vmem:[#allocation3 + $0x90] sm:$0xff] }
  0x40   : > { %v1763_v35 = vrot.slane %v689_v27, %v841_v22  ;;  %v497_v38 = vrot.slane %v486_v28, %v496_v12  ;;  %v1769_v39 = vrot.slane %v689_v27, %v866_v23  ;;  %v493_v40 = vrot.slane %v486_v28, %v492_v24  ;;  %v753_v44 = vld [vmem:[#allocation3 + $0x88] sm:$0xff]  ;;  %v780_v59 = vld [vmem:[#allocation3 + $0x78] sm:$0xff]  ;;  %v1524_v5 = vld [vmem:[%s1715_s28 + $0x40] sm:$0xff]  }
  0x41   : > { %v1772_v41 = vrot.slane %v1751_v26, %v492_v24  ;;  %v1774_v45 = vrot.slane %v689_v27, %v492_v24  ;;  %v1777_v46 = vrot.slane %v1751_v26, %v741_v13  ;;  %v1780_v47 = vrot.slane %v1751_v26, %v766_v15  ;;  %v803_v60 = vld [vmem:[#allocation3 + $0x58] sm:$0xff]  ;;  %v805_v3 = vld [vmem:[#allocation3 + $0xc8] sm:$0xff]  ;;  %v853_v12 = vld [vmem:[#allocation3 + $0xd0] sm:$0xff] }
  0x42   : > { %1422 = vmatpush3.bf16.msra.mxu0 %v1515_v9  ;;  %v1783_v48 = vrot.slane %v1751_v26, %v791_v17  ;;  %vm1786_vm1 = vcmp.eq.s32.totalorder %v1727_v8, %v497_v38  ;;  %vm1790_vm2 = vcmp.eq.s32.totalorder %v489_v11, %v497_v38  ;;  %vm1795_vm3 = vcmp.eq.s32.totalorder %v1727_v8, %v493_v40  ;;  %v1523_v61 = vld [vmem:[%s1715_s28 + $0x8] sm:$0xff]   ;;  %v855_v17 = vld [vmem:[#allocation3 + $0x28] sm:$0xff]  ;;  %v879_v8 = vld [vmem:[#allocation3 + $0x20] sm:$0xff] }
  0x43   : > { %1423 = vmatprep.subr.bf16.mxu0 %v1516_v10  ;;  %vm1799_vm4 = vcmp.eq.s32.totalorder %v489_v11, %v493_v40  ;;  %vm1404_vm5 = vmpackc.low %vm1790_vm2, %vm1786_vm1  ;;  %v723_v55 = vsel %vm1786_vm1, %v721_v30, -inf  ;;  %v725_v56 = vsel %vm1790_vm2, %v721_v30, -inf  ;;  %v748_v57 = vsel %vm1786_vm1, %v746_v31, -inf  ;;  %v830_v11 = vld [vmem:[#allocation3 + $0xc0] sm:$0xff]  ;;  %v880_v28 = vld [vmem:[#allocation3 + $0x98] sm:$0xff] }
  0x44   : > { %v750_v58 = vsel %vm1790_vm2, %v746_v31, -inf  ;;  %1405 = vmatprep.mubr.msk.bf16.mxu0 %vm1404_vm5, %v1586_v62  ;;  %v732_v63 = vmax.f32 %v728_v42, %v723_v55  ;;  %v734_v0 = vmax.f32 %v730_v43, %v725_v56  ;;  %v757_v1 = vmax.f32 %v753_v44, %v748_v57  ;;  %v702_v30 = vld [vmem:[#allocation3 + $0xb0] sm:$0xff]  ;;  %v705_v38 = vld [vmem:[#allocation3 + $0x18] sm:$0xff]  ;;  %v752_v57 = vld [vmem:[#allocation3 + $0x80] sm:$0xff] }
  0x45   : > { %v773_v2 = vsel %vm1786_vm1, %v771_v32, -inf  ;;  %v759_v6 = vmax.f32 %v755_v51, %v750_v58  ;;  %v775_v7 = vsel %vm1790_vm2, %v771_v32, -inf  ;;  %v798_v10 = vsel %vm1786_vm1, %v796_v33, -inf  ;;  %v727_v44 = vld [vmem:[#allocation3 + $0x50] sm:$0xff]  ;;  %v754_v58 = vld [vmem:[#allocation3 + $0xe8] sm:$0xff]  ;;  %vm1406_vm6 = vmpackc.low %vm1799_vm4, %vm1795_vm3 }
  0x46   : > { %1424 = vmatpush3.bf16.msra.mxu0 %v1517_v14  ;;  %v782_v9 = vmax.f32 %v778_v52, %v773_v2  ;;  %736 = vst [vmem:[#allocation3 + $0x68] sm:$0xff] %v732_v63  ;;  %738 = vst [vmem:[#allocation3 + $0x48] sm:$0xff] %v734_v0  ;;  %v784_v13 = vmax.f32 %v780_v59, %v775_v7  ;;  %v800_v14 = vsel %vm1790_vm2, %v796_v33, -inf  ;;  %v825_v24 = vsel %vm1790_vm2, %v1759_v34, -inf  ;;  %v729_v56 = vld [vmem:[#allocation3 + $0x30] sm:$0xff]  ;;  %v777_v0 = vld [vmem:[#allocation3 + $0x60] sm:$0xff] }
  0x47   : > { %1425 = vmatprep.subr.bf16.mxu0 %v1518_v16  ;;  %761 = vst [vmem:[#allocation3 + $0x88] sm:$0xff] %v757_v1  ;;  %v807_v15 = vmax.f32 %v803_v60, %v798_v10  ;;  %v823_v16 = vsel %vm1786_vm1, %v1759_v34, -inf  ;;  %763 = vst [vmem:[#allocation3 + $0xb8] sm:$0xff] %v759_v6  ;;  %v809_v21 = vmax.f32 %v805_v3, %v800_v14  ;;  %v848_v27 = vsel %vm1786_vm1, %v1763_v35, -inf  ;;  %v779_v49 = vld [vmem:[#allocation3 + $0x8] sm:$0xff]  ;;  %v802_v2 = vld [vmem:[#allocation3 + $0x38] sm:$0xff] }
  0x48   : > { %786 = vst [vmem:[#allocation3 + $0xf0] sm:$0xff] %v782_v9  ;;  %v832_v25 = vmax.f32 %v828_v4, %v823_v16  ;;  %788 = vst [vmem:[#allocation3 + $0x78] sm:$0xff] %v784_v13  ;;  %v834_v31 = vmax.f32 %v830_v11, %v825_v24  ;;  %v850_v32 = vsel %vm1790_vm2, %v1763_v35, -inf  ;;  %v857_v33 = vmax.f32 %v853_v12, %v848_v27  ;;  %v804_v3 = vld [vmem:[#allocation3 + $0x40] sm:$0xff] }
  0x49   : > { %811 = vst [vmem:[#allocation3 + $0x58] sm:$0xff] %v807_v15  ;;  %v873_v34 = vsel %vm1786_vm1, %v1769_v39, -inf  ;;  %813 = vst [vmem:[#allocation3 + $0xc8] sm:$0xff] %v809_v21  ;;  %v859_v40 = vmax.f32 %v855_v17, %v850_v32  ;;  %v875_v42 = vsel %vm1790_vm2, %v1769_v39, -inf  ;;  %v698_v35 = vsel %vm1795_vm3, %v1772_v41, -inf  ;;  %v827_v14 = vld [vmem:[#allocation3 + $0xe0] sm:$0xff] }
  0x4a   : > { %1426 = vmatpush3.bf16.msra.mxu0 %v1519_v18  ;;  %v878_v18 = vld [vmem:[#allocation3 + $0xf8] sm:$0xff]  ;;  %836 = vst [vmem:[#allocation3 + $0x90] sm:$0xff] %v832_v25  ;;  %838 = vst [vmem:[#allocation3 + $0xc0] sm:$0xff] %v834_v31  ;;  %v884_v51 = vmax.f32 %v880_v28, %v875_v42  ;;  %v699_v52 = vsel %vm1786_vm1, %v1774_v45, -inf  ;;  %v700_v55 = vsel %vm1799_vm4, %v1772_v41, -inf  ;;  %v701_v39 = vsel %vm1790_vm2, %v1774_v45, -inf }
  0x4b   : > { %1427 = vmatprep.subr.bf16.mxu0 %v1520_v20  ;;  %v1525_v20 = vld [vmem:[%s1715_s28] sm:$0xff]   ;;  %v882_v43 = vmax.f32 %v878_v18, %v873_v34  ;;  %861 = vst [vmem:[#allocation3 + $0xd0] sm:$0xff] %v857_v33  ;;  %863 = vst [vmem:[#allocation3 + $0x28] sm:$0xff] %v859_v40  ;;  %v706_v59 = vmax.f32 %v702_v30, %v698_v35  ;;  %v709_v63 = vmax.f32 %v705_v38, %v701_v39  ;;  %v852_v17 = vld [vmem:[#allocation3 + $0xa8] sm:$0xff] }
  0x4c   : > { %888 = vst [vmem:[#allocation3 + $0x98] sm:$0xff] %v884_v51  ;;  %v722_v41 = vsel %vm1795_vm3, %v1755_v29, -inf  ;;  %v724_v45 = vsel %vm1799_vm4, %v1755_v29, -inf  ;;  %v747_v50 = vsel %vm1795_vm3, %v1777_v46, -inf  ;;  %v749_v1 = vsel %vm1799_vm4, %v1777_v46, -inf  ;;  %v829_v15 = vld [vmem:[#allocation3 + $0x70] sm:$0xff] }
  0x4d   : > { %886 = vst [vmem:[#allocation3 + $0xf8] sm:$0xff] %v882_v43  ;;  %710 = vst [vmem:[#allocation3 + $0xb0] sm:$0xff] %v706_v59  ;;  %v731_v4 = vmax.f32 %v727_v44, %v722_v41  ;;  %v756_v6 = vmax.f32 %v752_v57, %v747_v50  ;;  %v758_v7 = vmax.f32 %v754_v58, %v749_v1  ;;  %v772_v29 = vsel %vm1795_vm3, %v1780_v47, -inf  ;;  %v877_v24 = vld [vmem:[#allocation3 + $0xa0] sm:$0xff]  ;;  %v512_v34 = vld [vmem:[#allocation2] sm:$0xff] }
  0x4e   : > { %1428 = vmatpush3.bf16.msra.mxu0 %v1521_v36  ;;  %v703_v36 = vld [vmem:[#allocation3] sm:$0xff]  ;;  %713 = vst [vmem:[#allocation3 + $0x18] sm:$0xff] %v709_v63  ;;  %v774_v9 = vsel %vm1799_vm4, %v1780_v47, -inf  ;;  %v797_v46 = vsel %vm1795_vm3, %v1783_v48, -inf  ;;  %v799_v10 = vsel %vm1799_vm4, %v1783_v48, -inf  ;;  %v781_v47 = vmax.f32 %v777_v0, %v772_v29  ;;  %v513_v42 = vld [vmem:[#allocation2 + $0x8] sm:$0xff] }
  0x4f   : > { %1429 = vmatprep.subr.bf16.mxu0 %v1522_v37  ;;  %v704_v37 = vld [vmem:[#allocation3 + $0xd8] sm:$0xff]  ;;  %v707_v60 = vmax.f32 %v703_v36, %v699_v52  ;;  %735 = vst [vmem:[#allocation3 + $0x50] sm:$0xff] %v731_v4  ;;  %760 = vst [vmem:[#allocation3 + $0x80] sm:$0xff] %v756_v6  ;;  %v783_v11 = vmax.f32 %v779_v49, %v774_v9  ;;  %v806_v12 = vmax.f32 %v802_v2, %v797_v46 }
  0x50   : > { %762 = vst [vmem:[#allocation3 + $0xe8] sm:$0xff] %v758_v7  ;;  %v808_v13 = vmax.f32 %v804_v3, %v799_v10  ;;  %v817_v48 = vrot.slane %v1751_v26, %v816_v19  ;;  %v842_v16 = vrot.slane %v1751_v26, %v841_v22  ;;  %v867_v18 = vrot.slane %v1751_v26, %v866_v23 }
  0x51   : > { %711 = vst [vmem:[#allocation3] sm:$0xff] %v707_v60  ;;  %785 = vst [vmem:[#allocation3 + $0x60] sm:$0xff] %v781_v47 }
  0x52   : > { %1430 = vmatpush3.bf16.msra.mxu0 %v1523_v61  ;;  %v708_v61 = vmax.f32 %v704_v37, %v700_v55  ;;  %787 = vst [vmem:[#allocation3 + $0x8] sm:$0xff] %v783_v11  ;;  %810 = vst [vmem:[#allocation3 + $0x38] sm:$0xff] %v806_v12  ;;  %v824_v19 = vsel %vm1799_vm4, %v817_v48, -inf  ;;  %v847_v21 = vsel %vm1795_vm3, %v842_v16, -inf  ;;  %v849_v22 = vsel %vm1799_vm4, %v842_v16, -inf }
  0x53   : > { %1431 = vmatprep.subr.bf16.mxu0 %v1524_v5  ;;  %v733_v5 = vmax.f32 %v729_v56, %v724_v45  ;;  %812 = vst [vmem:[#allocation3 + $0x40] sm:$0xff] %v808_v13  ;;  %v833_v23 = vmax.f32 %v829_v15, %v824_v19  ;;  %v856_v26 = vmax.f32 %v852_v17, %v847_v21  ;;  %v872_v28 = vsel %vm1795_vm3, %v867_v18, -inf }
  0x54   : > { %712 = vst [vmem:[#allocation3 + $0xd8] sm:$0xff] %v708_v61  ;;  %v874_v30 = vsel %vm1799_vm4, %v867_v18, -inf  ;;  %v881_v31 = vmax.f32 %v877_v24, %v872_v28 }
  0x55   : > { %737 = vst [vmem:[#allocation3 + $0x30] sm:$0xff] %v733_v5  ;;  %837 = vst [vmem:[#allocation3 + $0x70] sm:$0xff] %v833_v23  ;;  %v883_v32 = vmax.f32 %v879_v8, %v874_v30 }
  0x56   : > { %1432 = vmatpush3.bf16.msra.mxu0 %v1525_v20  ;;  %v822_v20 = vsel %vm1795_vm3, %v817_v48, -inf  ;;  %860 = vst [vmem:[#allocation3 + $0xa8] sm:$0xff] %v856_v26  ;;  %885 = vst [vmem:[#allocation3 + $0xa0] sm:$0xff] %v881_v31 }
  0x57   : > { %v831_v25 = vmax.f32 %v827_v14, %v822_v20  ;;  %887 = vst [vmem:[#allocation3 + $0x20] sm:$0xff] %v883_v32 }
  0x59   : > { %1407 = vmatmul.mubr.msk.bf16.vlgmr.msra.gmra.mxu0 %vm1406_vm6, %v1586_v62  ;;  %v854_v62 = vld [vmem:[#allocation3 + $0x10] sm:$0xff]  ;;  %835 = vst [vmem:[#allocation3 + $0xe0] sm:$0xff] %v831_v25 }
  0x5a   : > { %v858_v27 = vmax.f32 %v854_v62, %v849_v22 }
  0x5c   : > { %862 = vst [vmem:[#allocation3 + $0x10] sm:$0xff] %v858_v27 }
 0x119   : > { %v1433_v33 = vpop.f32.mrf.mxu0 }
 0x11b   : > { %v1434_v36 = vpop.f32.mrf.mxu0 }
 0x11c   : > { %v1435_v37 = vadd.f32 %v1434_v36, %v1433_v33 }
 0x11d   : > { %v1436_v38 = vpop.f32.mrf.mxu0 }
 0x11e   : > { %v683_v40 = vadd.f32 %v1435_v37, %v512_v34 }
 0x11f   : > { %v1437_v53 = vpop.f32.mrf.mxu0 }
 0x120   : > { %686 = vst.msk [vmem:[#allocation2] sm:$0xff] %vm443_vm0, %v683_v40  ;;  %v1438_v54 = vadd.f32 %v1437_v53, %v1436_v38 }
 0x122   : > { %v684_v43 = vadd.f32 %v1438_v54, %v513_v42 }
 0x124   : > { %687 = vst.msk [vmem:[#allocation2 + $0x8] sm:$0xff] %vm443_vm0, %v684_v43 }
 0x125 PF: > { %v923_v35 = vld [vmem:[#allocation3 + $0x50] sm:$0xff]  ;;  %v924_v44 = vld [vmem:[#allocation3 + $0x68] sm:$0xff]  ;;  %v1587_v52 = vmov 8   ;;  %v913_v59 = vld [vmem:[#allocation3] sm:$0xff]  ;;  %v1588_v32 = vmov 0   ;;  %s1589_s24 = smov 8  }
 0x126   : > { %1526 = vset.pattern.permute.xlu0 %v1587_v52  ;;  %v927_v55 = vmax.f32 %v923_v35, %v924_v44  ;;  %1527 = vset.pattern.permute.xlu1 %v1587_v52  ;;  %v912_v58 = vld [vmem:[#allocation3 + $0xb0] sm:$0xff]  ;;  %v926_v63 = vld [vmem:[#allocation3 + $0x48] sm:$0xff]  ;;  %v934_v49 = vld [vmem:[#allocation3 + $0x80] sm:$0xff]  ;;  %vm1034_vm9 = vcmask 277504   ;;  %vm999_vm10 = vcmask 7168   ;;  %vm1002_vm11 = vcmask 15360  }
 0x127   : > { %v1914_v51 = vld [vmem:[#allocation2] sm:$0xff]  ;;  %v916_v60 = vmax.f32 %v912_v58, %v913_v59  ;;  %v935_v41 = vld [vmem:[#allocation3 + $0x88] sm:$0xff]  ;;  %v937_v1 = vld [vmem:[#allocation3 + $0xb8] sm:$0xff]  ;;  %vm1005_vm12 = vcmask 23552   ;;  %vm1090_vm13 = vcmask 1041408   ;;  %vm1008_vm14 = vcmask 31744  }
 0x128   : > { %v896_v39 = vmax.f32 %v1914_v51, 1.0  ;;  %928 = vmax.xlane.f32.xlu1 %v927_v55  ;;  %v925_v61 = vld [vmem:[#allocation3 + $0x30] sm:$0xff]  ;;  %v938_v45 = vmax.f32 %v934_v49, %v935_v41  ;;  %v936_v50 = vld [vmem:[#allocation3 + $0xe8] sm:$0xff]  ;;  %v945_v3 = vld [vmem:[#allocation3 + $0x60] sm:$0xff]  ;;  %vm1020_vm8 = vcmp.gt.f32.partialorder %v1914_v51, 0.0  ;;  %vm1011_vm15 = vcmask 39936  }
 0x129   : > { %v930_v0 = vmax.f32 %v925_v61, %v926_v63  ;;  %v941_v2 = vmax.f32 %v936_v50, %v937_v1  ;;  %v946_v4 = vld [vmem:[#allocation3 + $0xf0] sm:$0xff]  ;;  %v947_v6 = vld [vmem:[#allocation3 + $0x8] sm:$0xff]  ;;  %v948_v7 = vld [vmem:[#allocation3 + $0x78] sm:$0xff]  ;;  %v1022_v34 = vsel %vm1020_vm8, 1, %v1588_v32  ;;  %vm1014_vm0 = vcmask 48128   ;;  %s1590_s25 = smov 16  }
 0x12a   : > { %900 = vperm.xlu0 %1526, %v896_v39   ;;  %v949_v5 = vmax.f32 %v945_v3, %v946_v4  ;;  %v914_v29 = vld [vmem:[#allocation3 + $0xd8] sm:$0xff]  ;;  %v952_v46 = vmax.f32 %v947_v6, %v948_v7  ;;  %v958_v12 = vld [vmem:[#allocation3 + $0x40] sm:$0xff]  ;;  %v959_v13 = vld [vmem:[#allocation3 + $0xc8] sm:$0xff]  ;;  %vm1017_vm1 = vcmask 56320   ;;  %vm1045_vm3 = vcmask 130112   ;;  %s1591_s26 = smov 24  }
 0x12b   : > { %v1917_v56 = vld [vmem:[#allocation2 + $0x8] sm:$0xff]  ;;  %v967_v48 = vld [vmem:[#allocation3 + $0xe0] sm:$0xff]  ;;  %v968_v15 = vld [vmem:[#allocation3 + $0x90] sm:$0xff]  ;;  %v963_v16 = vmax.f32 %v958_v12, %v959_v13  ;;  %vm1056_vm5 = vcmask 195712   ;;  %vm1067_vm6 = vcmask 261312   ;;  %vm1266_vm8 = vcmask 64512  }
 0x12c   : > { %v897_v57 = vmax.f32 %v1917_v56, 1.0  ;;  %v915_v9 = vld [vmem:[#allocation3 + $0x18] sm:$0xff]  ;;  %v969_v17 = vld [vmem:[#allocation3 + $0x70] sm:$0xff]  ;;  %v970_v62 = vld [vmem:[#allocation3 + $0xc0] sm:$0xff]  ;;  %v971_v18 = vmax.f32 %v967_v48, %v968_v15  ;;  %vm1021_vm7 = vcmp.gt.f32.partialorder %v1917_v56, 0.0 }
 0x12d   : > { %v956_v10 = vld [vmem:[#allocation3 + $0x38] sm:$0xff]  ;;  %v919_v11 = vmax.f32 %v914_v29, %v915_v9  ;;  %v978_v20 = vld [vmem:[#allocation3 + $0xa8] sm:$0xff]  ;;  %v979_v19 = vld [vmem:[#allocation3 + $0xd0] sm:$0xff]  ;;  %v974_v21 = vmax.f32 %v969_v17, %v970_v62  ;;  %v1023_v33 = vsel %vm1021_vm7, 1, %v1588_v32  ;;  %vm1182_vm7 = vcmask 261120  }
 0x12e   : > { %v957_v47 = vld [vmem:[#allocation3 + $0x58] sm:$0xff]  ;;  %v980_v22 = vld [vmem:[#allocation3 + $0x10] sm:$0xff]  ;;  %v981_v24 = vld [vmem:[#allocation3 + $0x28] sm:$0xff]  ;;  %v982_v8 = vmax.f32 %v978_v20, %v979_v19 }
 0x12f   : > { %v960_v14 = vmax.f32 %v956_v10, %v957_v47  ;;  %v989_v25 = vld [vmem:[#allocation3 + $0xa0] sm:$0xff]  ;;  %v990_v23 = vld [vmem:[#allocation3 + $0xf8] sm:$0xff]  ;;  %v985_v26 = vmax.f32 %v980_v22, %v981_v24  ;;  %v1927_v37 = vld [vmem:[%s1697_s14] sm:$0xff] }
 0x130   : > { %v991_v27 = vld [vmem:[#allocation3 + $0x20] sm:$0xff]  ;;  %v992_v28 = vld [vmem:[#allocation3 + $0x98] sm:$0xff]  ;;  %v993_v30 = vmax.f32 %v989_v25, %v990_v23  ;;  %1035 = vst.msk [vmem:[#allocation4] sm:$0xff] %vm1034_vm9, %v1927_v37  ;;  %v1076_v49 = vld [vmem:[%s1997_s6 + $0x20] sm:$0x3] }
 0x131   : > { %v996_v31 = vmax.f32 %v991_v27, %v992_v28  ;;  %v1924_v36 = vld [vmem:[%s1697_s14 + $0x8] sm:$0xff]  ;;  %1452 = vmatprep.subr.msk.mxu0 %vm1090_vm13, %v1076_v49  ;;  %v1075_v50 = vld [vmem:[%s1997_s6 + $0x18] sm:$0xff]  ;;  %v1074_v1 = vld [vmem:[%s1997_s6 + $0x10] sm:$0xff] }
 0x132   : > { %1036 = vst.msk [vmem:[#allocation4 + $0x8] sm:$0xff] %vm1034_vm9, %v1924_v36  ;;  %1453 = vmatpush3.msk.msra.mxu0 %vm1090_vm13, %v1076_v49  ;;  %v1073_v6 = vld [vmem:[%s1997_s6 + $0x8] sm:$0xff]  ;;  %v1072_v47 = vld [vmem:[%s1997_s6] sm:$0xff] }
 0x133   : > { %1454 = vmatprep.subr.mxu0 %v1075_v50  ;;  %v1172_v27 = vld [vmem:[%s1999_s8 + $0x8] sm:$0xff]  ;;  %v1171_v28 = vld [vmem:[%s1999_s8] sm:$0xff] }
 0x134   : > { %1455 = vmatpush3.msra.mxu0 %v1075_v50 }
 0x135   : > { %1456 = vmatprep.subr.mxu0 %v1074_v1 }
 0x136   : > { %1457 = vmatpush3.msra.mxu0 %v1074_v1 }
 0x137   : > { %1458 = vmatprep.subr.mxu0 %v1073_v6 }
 0x138   : > { %1459 = vmatpush3.msra.mxu0 %v1073_v6 }
 0x139   : > { %905 = vperm.xlu1 %1527, %v897_v57   ;;  %1460 = vmatprep.subr.mxu0 %v1072_v47 }
 0x13a   : > { %1461 = vmatpush3.msra.mxu0 %v1072_v47 }
 0x149   : > { %917 = vmax.xlane.f32.xlu0 %v916_v60 }
 0x14d   : > { %931 = vmax.xlane.f32.xlu0 %v930_v0 }
 0x151   : > { %939 = vmax.xlane.f32.xlu0 %v938_v45 }
 0x155   : > { %942 = vmax.xlane.f32.xlu0 %v941_v2 }
 0x159   : > { %950 = vmax.xlane.f32.xlu0 %v949_v5 }
 0x15d   : > { %953 = vmax.xlane.f32.xlu0 %v952_v46  ;;  %920 = vmax.xlane.f32.xlu1 %v919_v11 }
 0x161   : > { %961 = vmax.xlane.f32.xlu0 %v960_v14  ;;  %964 = vmax.xlane.f32.xlu1 %v963_v16 }
 0x165   : > { %972 = vmax.xlane.f32.xlu0 %v971_v18  ;;  %975 = vmax.xlane.f32.xlu1 %v974_v21 }
 0x169   : > { %983 = vmax.xlane.f32.xlu0 %v982_v8  ;;  %986 = vmax.xlane.f32.xlu1 %v985_v26  ;;  %v1173_v26 = vld [vmem:[%s1999_s8 + $0x10] sm:$0xff] }
 0x16d   : > { %994 = vmax.xlane.f32.xlu0 %v993_v30  ;;  %997 = vmax.xlane.f32.xlu1 %v996_v31  ;;  %v1408_v30 = vld [vmem:[%s1998_s7] ss:$0 sm:$0xff] }
 0x17e   : > { %1028 = vperm.xlu1 %1527, %v1023_v33  }
 0x182   : > { %1039 = vrot.lane.b32.xlu1 %v1914_v51, %s1589_s24 }
 0x183   : > { %1025 = vperm.xlu0 %1526, %v1022_v34  }
 0x187   : > { %1041 = vrot.lane.b32.xlu0 %v1917_v56, %s1589_s24 }
 0x1a5   : > { %v901_v38 = vpop.permute.xlu0 %900 }
 0x1b1   : > { %v929_v54 = vpop.xlane.xlu1 %928 }
 0x1b5   : > { %v906_v44 = vpop.permute.xlu1 %905 }
 0x1b6   : > { %1528 = vrcp.f32 %v906_v44 }
 0x1b7   : > { %1530 = vrcp.f32 %v901_v38 }
 0x1c3   : > { %v1529_v13 = vpop.eup %1528 }
 0x1c4   : > { %v1531_v17 = vpop.eup %1530  ;;  %v911_v20 = vmul.f32 %v1529_v13, %v1917_v56 }
 0x1c5   : > { %v909_v21 = vmul.f32 %v1531_v17, %v1914_v51  ;;  %v1174_v51 = vld [vmem:[%s1999_s8 + $0x18] sm:$0xff] }
 0x1c6   : > { %1465 = vmatprep.subr.mxu1 %v1174_v51 }
 0x1c7   : > { %1466 = vmatpush3.msra.mxu1 %v1174_v51 }
 0x1c8   : > { %1467 = vmatprep.subr.mxu1 %v1173_v26 }
 0x1c9   : > { %1468 = vmatpush3.msra.mxu1 %v1173_v26 }
 0x1ca   : > { %1469 = vmatprep.subr.mxu1 %v1172_v27 }
 0x1cb   : > { %1470 = vmatpush3.msra.mxu1 %v1172_v27 }
 0x1cc   : > { %1471 = vmatprep.subr.mxu1 %v1171_v28 }
 0x1cd   : > { %1472 = vmatpush3.msra.mxu1 %v1171_v28 }
 0x1d2   : > { %v918_v40 = vpop.xlane.xlu0 %917 }
 0x1d3   : > { %v1000_v2 = vsel %vm999_vm10, %v918_v40, %v929_v54 }
 0x1d6   : > { %v932_v42 = vpop.xlane.xlu0 %931 }
 0x1da   : > { %v940_v53 = vpop.xlane.xlu0 %939 }
 0x1db   : > { %v1003_v3 = vsel %vm1002_vm11, %v1000_v2, %v940_v53 }
 0x1de   : > { %v943_v43 = vpop.xlane.xlu0 %942 }
 0x1e2   : > { %v951_v35 = vpop.xlane.xlu0 %950 }
 0x1e3   : > { %v1006_v7 = vsel %vm1005_vm12, %v1003_v3, %v951_v35 }
 0x1e6   : > { %v954_v52 = vpop.xlane.xlu0 %953  ;;  %v921_v55 = vpop.xlane.xlu1 %920 }
 0x1e7   : > { %v1001_v60 = vsel %vm999_vm10, %v921_v55, %v932_v42  ;;  %v1412_v42 = vld [vmem:[%s2000_s9] ss:$0 sm:$0xff] }
 0x1e8   : > { %v1004_v61 = vsel %vm1002_vm11, %v1001_v60, %v943_v43 }
 0x1e9   : > { %v1007_v41 = vsel %vm1005_vm12, %v1004_v61, %v954_v52 }
 0x1ea   : > { %v962_v39 = vpop.xlane.xlu0 %961  ;;  %v965_v57 = vpop.xlane.xlu1 %964 }
 0x1eb   : > { %v1010_v4 = vsel %vm1008_vm14, %v1007_v41, %v965_v57  ;;  %v1009_v9 = vsel %vm1008_vm14, %v1006_v7, %v962_v39 }
 0x1ee   : > { %v973_v58 = vpop.xlane.xlu0 %972  ;;  %v976_v59 = vpop.xlane.xlu1 %975 }
 0x1ef   : > { %v1013_v29 = vsel %vm1011_vm15, %v1010_v4, %v976_v59  ;;  %v1012_v11 = vsel %vm1011_vm15, %v1009_v9, %v973_v58 }
 0x1f2   : > { %v984_v63 = vpop.xlane.xlu0 %983  ;;  %v987_v0 = vpop.xlane.xlu1 %986 }
 0x1f3   : > { %v1016_v46 = vsel %vm1014_vm0, %v1013_v29, %v987_v0  ;;  %v1015_v14 = vsel %vm1014_vm0, %v1012_v11, %v984_v63 }
 0x1f6   : > { %v998_v45 = vpop.xlane.xlu1 %997  ;;  %v995_v5 = vpop.xlane.xlu0 %994 }
 0x1f7   : > { %v1019_v12 = vsel %vm1017_vm1, %v1016_v46, %v998_v45  ;;  %v1018_v16 = vsel %vm1017_vm1, %v1015_v14, %v995_v5 }
 0x1fa   : > { %v1029_v10 = vpop.permute.xlu1 %1028 }
 0x1fb   : > { %vm1031_vm2 = vcmp.eq.s32.totalorder %v1029_v10, 1 }
 0x1fc   : > { %v1033_v48 = vsel %vm1031_vm2, %v1019_v12, 0.0 }
 0x1fd   : > { %1052 = vrot.lane.b32.xlu0 %v1033_v48, %s1590_s25 }
 0x1fe   : > { %v1026_v15 = vpop.permute.xlu0 %1025  ;;  %v1040_v18 = vpop.permute.xlu1 %1039 }
 0x1ff   : > { %vm1030_vm4 = vcmp.eq.s32.totalorder %v1026_v15, 1  ;;  %1046 = vst.msk [vmem:[#allocation4] sm:$0xff] %vm1045_vm3, %v1040_v18 }
 0x200   : > { %v1032_v62 = vsel %vm1030_vm4, %v1018_v16, 0.0 }
 0x201   : > { %1050 = vrot.lane.b32.xlu1 %v1032_v62, %s1590_s25  ;;  %1063 = vrot.lane.b32.xlu0 %v911_v20, %s1591_s26 }
 0x202   : > { %v1042_v19 = vpop.permute.xlu0 %1041 }
 0x203   : > { %1047 = vst.msk [vmem:[#allocation4 + $0x8] sm:$0xff] %vm1045_vm3, %v1042_v19 }
 0x205   : > { %1061 = vrot.lane.b32.xlu1 %v909_v21, %s1591_s26 }
 0x26f   : > { %v1053_v22 = vpop.permute.xlu0 %1052 }
 0x270   : > { %1058 = vst.msk [vmem:[#allocation4 + $0x8] sm:$0xff] %vm1056_vm5, %v1053_v22 }
 0x273   : > { %v1051_v24 = vpop.permute.xlu1 %1050  ;;  %v1064_v8 = vpop.permute.xlu0 %1063 }
 0x274   : > { %1057 = vst.msk [vmem:[#allocation4] sm:$0xff] %vm1056_vm5, %v1051_v24 }
 0x275   : > { %1069 = vst.msk [vmem:[#allocation4 + $0x8] sm:$0xff] %vm1067_vm6, %v1064_v8 }
 0x277   : > { %v1062_v25 = vpop.permute.xlu1 %1061 }
 0x278   : > { %1068 = vst.msk [vmem:[#allocation4] sm:$0xff] %vm1067_vm6, %v1062_v25 }
 0x27c   : > { %v1071_v23 = vld [vmem:[#allocation4 + $0x8] sm:$0xff] }
 0x27f   : > { %v1070_v56 = vld [vmem:[#allocation4] sm:$0xff] }
 0x280   : > { %1462 = vmatprep.mubr.msk.f32.mxu0 %vm1034_vm9, %v1070_v56 }
 0x281   : > { %1463 = vmatmul.mubr.msk.f32.vlgmr.msra.gmra.mxu0 %vm1034_vm9, %v1071_v23 }
 0x341   : > { %v1464_v31 = vpop.f32.mrf.mxu0 }
 0x342   : > { %v1166_v32 = vadd.f32 %v1464_v31, %v1408_v30 }
 0x343   : > { %v1160_v33 = vpop.f32.mrf.mxu0 }
 0x344   : > { %v1161_v34 = vadd.f32 %v1408_v30, %v1160_v33  ;;  %v1170_v40 = vmax.f32 %v1166_v32, 0.0 }
 0x346   : > { %v1169_v38 = vmax.f32 %v1161_v34, 0.0 }
 0x348   : > { %1473 = vmatprep.mubr.msk.f32.mxu1 %vm1182_vm7, %v1169_v38 }
 0x349   : > { %1474 = vmatmul.mubr.msk.f32.vlgmr.msra.gmra.mxu1 %vm1182_vm7, %v1170_v40 }
 0x409   : > { %v1475_v53 = vpop.f32.mrf.mxu1 }
 0x40a   : > { %v1261_v54 = vadd.f32 %v1475_v53, %v1412_v42 }
 0x40b   : > { %v1255_v43 = vpop.f32.mrf.mxu1 }
 0x40c   : > { %v1256_v35 = vadd.f32 %v1412_v42, %v1255_v43  ;;  %v1265_v52 = vadd.f32 %v1261_v54, %v1924_v36 }
 0x40e   : > { %v1264_v44 = vadd.f32 %v1256_v35, %v1927_v37  ;;  %1268 = vst.msk [vmem:[%s1710_s27 + $0x8] sm:$0xff] %vm1266_vm8, %v1265_v52 }
 0x410   : > { %1267 = vst.msk [vmem:[%s1710_s27] sm:$0xff] %vm1266_vm8, %v1264_v44 }
 0x411 PF: > { %s30_s23 = sadd.s32 1, %s1580_s23   ;;  %s2015_s17 = sld [smem:[#allocation9_spill]] }
 0x412   : > { %p27_p5 = scmp.ge.s32.totalorder %s30_s23, 4   ;;  %s2016_s1 = smov %s1576_s22 }
 0x414   :  { %29 = sbr.rel (!%p27_p5) target bundleno = 28 (0x1c), region = 117 }
 0x417   : > { %s2017_s22 = smov %s2015_s17 }

</bundles_post_ra>
